<compile_context>
chip_gen: v7x
topology: tpu7x:2x2x1
jax: 0.10.0
libtpu: 0.0.40
codegen_flags: <defaults>
</compile_context>

<pallas_src>
import functools

import jax
import jax.numpy as jnp
from jax.experimental import pallas as pl
from jax.experimental.pallas import tpu as pltpu

_LANE = 128


def _round_up(n, m):
    return ((n + m - 1) // m) * m


def _has_bf16_vpu():
    """True on chips whose VPU supports bf16 elementwise ops (v6e, v7x)."""
    try:
        kind = jax.devices()[0].device_kind.lower()
    except Exception:
        return True
    # v2/v3/v4/v5x have no bf16 VPU; default to bf16 for newer generations.
    return not any(tag in kind for tag in ("v2", "v3", "v4", "v5"))


def _mlp_kernel(x_ref,
                w1_ref, b1_ref, w2_ref, b2_ref, w3_ref, b3_ref,
                w4_ref, b4_ref, w5_ref, b5_ref, w6_ref, b6_ref,
                o_ref, *, bf16_vpu):
    """Whole forward pass for one (TB, F_pad) batch tile; weights VMEM-resident."""
    act_dtype = w1_ref.dtype          # bf16 on the fast path, f32 on the parity path
    h = x_ref[...]                    # (TB, F_pad), already in act_dtype

    def hidden(h, w_ref, b_ref):
        # MXU: act_dtype operands, f32 accumulation.
        y = jnp.dot(h, w_ref[...], preferred_element_type=jnp.float32)
        if bf16_vpu:
            # v6e/v7x: single f32->bf16 cast, bias-add + ReLU in bf16.
            y = y.astype(act_dtype) + b_ref[...]
            return jnp.maximum(y, 0.0)
        # v5e path: bias-add/ReLU in f32 (no bf16 VPU), carry activation in bf16.
        y = y + b_ref[...].astype(jnp.float32)
        return jnp.maximum(y, 0.0).astype(act_dtype)

    h = hidden(h, w1_ref, b1_ref)     # (TB, 512)
    h = hidden(h, w2_ref, b2_ref)     # (TB, 256)
    h = hidden(h, w3_ref, b3_ref)     # (TB, 128)
    h = hidden(h, w4_ref, b4_ref)     # (TB, 128)  (64 real + 64 zero lanes)
    h = hidden(h, w5_ref, b5_ref)     # (TB, 128)  (32 real + 96 zero lanes)

    # Final layer + sigmoid kept in f32 (only 128 lanes -> negligible VALU cost,
    # better logit accuracy); lane-dense (TB, 128) store in o_ref.dtype (bf16).
    logits = jnp.dot(h, w6_ref[...], preferred_element_type=jnp.float32)
    logits = logits + b6_ref[...].astype(jnp.float32)
    o_ref[...] = jax.nn.sigmoid(logits).astype(o_ref.dtype)


def mlp_forward(x, params, *, batch_tile=None, use_bf16=True, bf16_vpu=True):
    """x: (B, F) float32.  params: list of (W_t, b) with W_t shape (in, out),
    b shape (1, out) -- unpadded, matching PyTorch nn.Linear (W_t = W.T).
    Returns (B, 1) float32."""
    B, F = x.shape

    if batch_tile is None:
        # ~2 grid steps for small batches (keeps both v7x TCs busy, amortizes
        # per-step overhead on single-core v5e/v6e); multiples of 256 to fill
        # the 256-wide v6e/v7x MXU; cap at 1024 rows per tile.
        batch_tile = min(1024, max(256, _round_up((B + 1) // 2, 256)))
    TB = _round_up(max(8, int(batch_tile)), 8)

    B_pad = _round_up(B, TB)
    F_pad = _round_up(F, _LANE)

    mm_dtype = jnp.bfloat16 if use_bf16 else jnp.float32
    out_dtype = mm_dtype

    # Zero-pad batch (whole number of tiles) and feature lanes; feed x in the
    # matmul dtype so the per-step input DMA is halved on the bf16 path.
    x_p = jnp.pad(x, ((0, B_pad - B), (0, F_pad - F))).astype(mm_dtype)

    # Zero-pad every weight / bias so all matmul operands are (8,128)-aligned.
    # Zero padding is an exact pass-through (0-weight, 0-bias, ReLU(0)=0).
    padded = []
    in_dim = F_pad
    n_layers = len(params)
    for idx, (w, b) in enumerate(params):
        out_dim = _round_up(w.shape[1], _LANE)
        w_p = jnp.pad(w, ((0, in_dim - w.shape[0]), (0, out_dim - w.shape[1])))
        b_p = jnp.pad(b, ((0, 0), (0, out_dim - b.shape[1])))
        is_last = idx == n_layers - 1
        # Hidden biases in the activation dtype (bf16 bias-add); final bias f32.
        b_dtype = jnp.float32 if is_last else mm_dtype
        padded.append((w_p.astype(mm_dtype), b_p.astype(b_dtype)))
        in_dim = out_dim
    out_pad = in_dim  # padded width of the last layer (= 128)

    grid = (B_pad // TB,)

    # Batch tile marches over the grid; every weight/bias is a single full block
    # with a constant (0, 0) index_map so it stays resident in VMEM.
    in_specs = [pl.BlockSpec((TB, F_pad), lambda i: (i, 0))]
    flat_params = []
    for (w_p, b_p) in padded:
        in_specs.append(pl.BlockSpec(w_p.shape, lambda i: (0, 0)))
        in_specs.append(pl.BlockSpec(b_p.shape, lambda i: (0, 0)))
        flat_params.extend([w_p, b_p])

    # Lane-dense output slab (last dim = 128), stored in bf16 on the fast path;
    # the real result is column 0, sliced (and upcast) by the wrapper.
    out_spec = pl.BlockSpec((TB, out_pad), lambda i: (i, 0))

    out = pl.pallas_call(
        functools.partial(_mlp_kernel, bf16_vpu=bool(bf16_vpu)),
        out_shape=jax.ShapeDtypeStruct((B_pad, out_pad), out_dtype),
        grid_spec=pltpu.PrefetchScalarGridSpec(
            num_scalar_prefetch=0,
            grid=grid,
            in_specs=in_specs,
            out_specs=out_spec,
        ),
        compiler_params=pltpu.CompilerParams(
            dimension_semantics=("parallel",),
            vmem_limit_bytes=32 * 1024 * 1024,
        ),
    )(x_p, *flat_params)

    return out[:B, :1].astype(jnp.float32)


def init_params(key, num_features):
    """Deterministic init matching PyTorch nn.Linear default
    (uniform(-1/sqrt(fan_in), 1/sqrt(fan_in))).  Weights returned transposed
    to (in, out); biases as (1, out)."""
    sizes = [num_features, 512, 256, 128, 64, 32, 1]
    params = []
    for fan_in, fan_out in zip(sizes[:-1], sizes[1:]):
        key, kw, kb = jax.random.split(key, 3)
        bound = 1.0 / (fan_in ** 0.5)
        w_t = jax.random.uniform(kw, (fan_in, fan_out), jnp.float32, -bound, bound)
        b = jax.random.uniform(kb, (1, fan_out), jnp.float32, -bound, bound)
        params.append((w_t, b))
    return params


def mlp_reference(x, params, *, use_bf16=False, bf16_vpu=True):
    """Pure-JAX reference.  With use_bf16=True it mirrors the kernel's recipe
    exactly (bf16 MXU operands, f32 accumulation, bf16 activation carry, f32
    final layer, bf16 output store)."""
    n = len(params)
    if not use_bf16:
        h = x
        for i, (w, b) in enumerate(params):
            y = h @ w + b
            h = jnp.maximum(y, 0.0) if i < n - 1 else y
        return jax.nn.sigmoid(h)

    h = x.astype(jnp.bfloat16)
    for i, (w, b) in enumerate(params):
        y = jnp.dot(h, w.astype(jnp.bfloat16), preferred_element_type=jnp.float32)
        if i == n - 1:
            y = y + b  # final layer: f32 bias, f32 sigmoid, bf16 store
            return jax.nn.sigmoid(y).astype(jnp.bfloat16).astype(jnp.float32)
        if bf16_vpu:
            y = y.astype(jnp.bfloat16) + b.astype(jnp.bfloat16)
            h = jnp.maximum(y, 0.0)
        else:
            y = y + b.astype(jnp.bfloat16).astype(jnp.float32)
            h = jnp.maximum(y, 0.0).astype(jnp.bfloat16)
    return h  # unreachable


if __name__ == "__main__":
    key = jax.random.PRNGKey(0)
    num_features = 24   # small synthetic feature count (as in the homework data)
    batch = 512         # auto tile -> TB=256, grid=2 (both v7x TCs engaged)

    k_x, k_p = jax.random.split(key)
    x = jax.random.normal(k_x, (batch, num_features), jnp.float32)
    params = init_params(k_p, num_features)

    bf16_vpu = _has_bf16_vpu()
    fwd = jax.jit(functools.partial(mlp_forward, use_bf16=True, bf16_vpu=bf16_vpu))
    out = jax.block_until_ready(fwd(x, params))

    assert out.shape == (batch, 1)

    # Tight check against the exact-mirroring bf16 reference, loose sanity
    # check against the pure-f32 PyTorch-equivalent reference.
    ref_bf16 = mlp_reference(x, params, use_bf16=True, bf16_vpu=bf16_vpu)
    ref_f32 = mlp_reference(x, params, use_bf16=False)
    assert jnp.allclose(out, ref_bf16, atol=5e-3, rtol=5e-3), "mismatch vs bf16 reference"
    assert jnp.allclose(out, ref_f32, atol=5e-2, rtol=5e-2), "mismatch vs f32 reference"

    print("KERNEL_OK")
</pallas_src>

<mosaic_0001>
module attributes {stable_mosaic.version = 11 : i64} {
  func.func @_mlp_kernel(%arg0: i32, %arg1: memref<256x128xbf16, #tpu.memory_space<vmem>>, %arg2: memref<128x512xbf16, #tpu.memory_space<vmem>>, %arg3: memref<1x512xbf16, #tpu.memory_space<vmem>>, %arg4: memref<512x256xbf16, #tpu.memory_space<vmem>>, %arg5: memref<1x256xbf16, #tpu.memory_space<vmem>>, %arg6: memref<256x128xbf16, #tpu.memory_space<vmem>>, %arg7: memref<1x128xbf16, #tpu.memory_space<vmem>>, %arg8: memref<128x128xbf16, #tpu.memory_space<vmem>>, %arg9: memref<1x128xbf16, #tpu.memory_space<vmem>>, %arg10: memref<128x128xbf16, #tpu.memory_space<vmem>>, %arg11: memref<1x128xbf16, #tpu.memory_space<vmem>>, %arg12: memref<128x128xbf16, #tpu.memory_space<vmem>>, %arg13: memref<1x128xf32, #tpu.memory_space<vmem>>, %arg14: memref<256x128xbf16, #tpu.memory_space<vmem>>) attributes {dimension_semantics = [#tpu.dimension_semantics<parallel>], iteration_bounds = array<i64: 2>, scalar_prefetch = 0 : i64, scratch_operands = 0 : i64, tpu.core_type = #tpu.core_type<tc>, window_params = [{transform_indices = @transform_0, window_bounds = array<i64: 256, 128>}, {pipeline_mode = #tpu.pipeline_mode<synchronous>, transform_indices = @transform_1, window_bounds = array<i64: 128, 512>}, {pipeline_mode = #tpu.pipeline_mode<synchronous>, transform_indices = @transform_2, window_bounds = array<i64: 1, 512>}, {pipeline_mode = #tpu.pipeline_mode<synchronous>, transform_indices = @transform_3, window_bounds = array<i64: 512, 256>}, {pipeline_mode = #tpu.pipeline_mode<synchronous>, transform_indices = @transform_4, window_bounds = array<i64: 1, 256>}, {pipeline_mode = #tpu.pipeline_mode<synchronous>, transform_indices = @transform_5, window_bounds = array<i64: 256, 128>}, {pipeline_mode = #tpu.pipeline_mode<synchronous>, transform_indices = @transform_6, window_bounds = array<i64: 1, 128>}, {pipeline_mode = #tpu.pipeline_mode<synchronous>, transform_indices = @transform_7, window_bounds = array<i64: 128, 128>}, {pipeline_mode = #tpu.pipeline_mode<synchronous>, transform_indices = @transform_8, window_bounds = array<i64: 1, 128>}, {pipeline_mode = #tpu.pipeline_mode<synchronous>, transform_indices = @transform_9, window_bounds = array<i64: 128, 128>}, {pipeline_mode = #tpu.pipeline_mode<synchronous>, transform_indices = @transform_10, window_bounds = array<i64: 1, 128>}, {pipeline_mode = #tpu.pipeline_mode<synchronous>, transform_indices = @transform_11, window_bounds = array<i64: 128, 128>}, {pipeline_mode = #tpu.pipeline_mode<synchronous>, transform_indices = @transform_12, window_bounds = array<i64: 1, 128>}, {transform_indices = @transform_13, window_bounds = array<i64: 256, 128>}]} {
    %c0 = arith.constant 0 : index
    %c0_0 = arith.constant 0 : index
    %0 = vector.load %arg1[%c0, %c0_0] : memref<256x128xbf16, #tpu.memory_space<vmem>>, vector<256x128xbf16>
    %c0_1 = arith.constant 0 : index
    %c0_2 = arith.constant 0 : index
    %1 = vector.load %arg2[%c0_1, %c0_2] : memref<128x512xbf16, #tpu.memory_space<vmem>>, vector<128x512xbf16>
    %cst = arith.constant dense<0.000000e+00> : vector<256x512xf32>
    %2 = tpu.matmul %0, %1, %cst {dimension_numbers = #tpu.dot_dimension_numbers<[1], [0], [0], [1], [0, 0, 1, 1], [], []>} : vector<256x128xbf16>, vector<128x512xbf16>, vector<256x512xf32> -> vector<256x512xf32>
    %3 = arith.truncf %2 : vector<256x512xf32> to vector<256x512xbf16>
    %c0_3 = arith.constant 0 : index
    %c0_4 = arith.constant 0 : index
    %4 = vector.load %arg3[%c0_3, %c0_4] : memref<1x512xbf16, #tpu.memory_space<vmem>>, vector<1x512xbf16>
    %5 = vector.broadcast %4 : vector<1x512xbf16> to vector<256x512xbf16>
    %6 = arith.addf %3, %5 : vector<256x512xbf16>
    %cst_5 = arith.constant 0.000000e+00 : bf16
    %7 = vector.broadcast %cst_5 : bf16 to vector<256x512xbf16>
    %8 = arith.maximumf %6, %7 : vector<256x512xbf16>
    %c0_6 = arith.constant 0 : index
    %c0_7 = arith.constant 0 : index
    %9 = vector.load %arg4[%c0_6, %c0_7] : memref<512x256xbf16, #tpu.memory_space<vmem>>, vector<512x256xbf16>
    %cst_8 = arith.constant dense<0.000000e+00> : vector<256x256xf32>
    %10 = tpu.matmul %8, %9, %cst_8 {dimension_numbers = #tpu.dot_dimension_numbers<[1], [0], [0], [1], [0, 0, 1, 1], [], []>} : vector<256x512xbf16>, vector<512x256xbf16>, vector<256x256xf32> -> vector<256x256xf32>
    %11 = arith.truncf %10 : vector<256x256xf32> to vector<256x256xbf16>
    %c0_9 = arith.constant 0 : index
    %c0_10 = arith.constant 0 : index
    %12 = vector.load %arg5[%c0_9, %c0_10] : memref<1x256xbf16, #tpu.memory_space<vmem>>, vector<1x256xbf16>
    %13 = vector.broadcast %12 : vector<1x256xbf16> to vector<256x256xbf16>
    %14 = arith.addf %11, %13 : vector<256x256xbf16>
    %cst_11 = arith.constant 0.000000e+00 : bf16
    %15 = vector.broadcast %cst_11 : bf16 to vector<256x256xbf16>
    %16 = arith.maximumf %14, %15 : vector<256x256xbf16>
    %c0_12 = arith.constant 0 : index
    %c0_13 = arith.constant 0 : index
    %17 = vector.load %arg6[%c0_12, %c0_13] : memref<256x128xbf16, #tpu.memory_space<vmem>>, vector<256x128xbf16>
    %cst_14 = arith.constant dense<0.000000e+00> : vector<256x128xf32>
    %18 = tpu.matmul %16, %17, %cst_14 {dimension_numbers = #tpu.dot_dimension_numbers<[1], [0], [0], [1], [0, 0, 1, 1], [], []>} : vector<256x256xbf16>, vector<256x128xbf16>, vector<256x128xf32> -> vector<256x128xf32>
    %19 = arith.truncf %18 : vector<256x128xf32> to vector<256x128xbf16>
    %c0_15 = arith.constant 0 : index
    %c0_16 = arith.constant 0 : index
    %20 = vector.load %arg7[%c0_15, %c0_16] : memref<1x128xbf16, #tpu.memory_space<vmem>>, vector<1x128xbf16>
    %21 = vector.broadcast %20 : vector<1x128xbf16> to vector<256x128xbf16>
    %22 = arith.addf %19, %21 : vector<256x128xbf16>
    %cst_17 = arith.constant 0.000000e+00 : bf16
    %23 = vector.broadcast %cst_17 : bf16 to vector<256x128xbf16>
    %24 = arith.maximumf %22, %23 : vector<256x128xbf16>
    %c0_18 = arith.constant 0 : index
    %c0_19 = arith.constant 0 : index
    %25 = vector.load %arg8[%c0_18, %c0_19] : memref<128x128xbf16, #tpu.memory_space<vmem>>, vector<128x128xbf16>
    %cst_20 = arith.constant dense<0.000000e+00> : vector<256x128xf32>
    %26 = tpu.matmul %24, %25, %cst_20 {dimension_numbers = #tpu.dot_dimension_numbers<[1], [0], [0], [1], [0, 0, 1, 1], [], []>} : vector<256x128xbf16>, vector<128x128xbf16>, vector<256x128xf32> -> vector<256x128xf32>
    %27 = arith.truncf %26 : vector<256x128xf32> to vector<256x128xbf16>
    %c0_21 = arith.constant 0 : index
    %c0_22 = arith.constant 0 : index
    %28 = vector.load %arg9[%c0_21, %c0_22] : memref<1x128xbf16, #tpu.memory_space<vmem>>, vector<1x128xbf16>
    %29 = vector.broadcast %28 : vector<1x128xbf16> to vector<256x128xbf16>
    %30 = arith.addf %27, %29 : vector<256x128xbf16>
    %cst_23 = arith.constant 0.000000e+00 : bf16
    %31 = vector.broadcast %cst_23 : bf16 to vector<256x128xbf16>
    %32 = arith.maximumf %30, %31 : vector<256x128xbf16>
    %c0_24 = arith.constant 0 : index
    %c0_25 = arith.constant 0 : index
    %33 = vector.load %arg10[%c0_24, %c0_25] : memref<128x128xbf16, #tpu.memory_space<vmem>>, vector<128x128xbf16>
    %cst_26 = arith.constant dense<0.000000e+00> : vector<256x128xf32>
    %34 = tpu.matmul %32, %33, %cst_26 {dimension_numbers = #tpu.dot_dimension_numbers<[1], [0], [0], [1], [0, 0, 1, 1], [], []>} : vector<256x128xbf16>, vector<128x128xbf16>, vector<256x128xf32> -> vector<256x128xf32>
    %35 = arith.truncf %34 : vector<256x128xf32> to vector<256x128xbf16>
    %c0_27 = arith.constant 0 : index
    %c0_28 = arith.constant 0 : index
    %36 = vector.load %arg11[%c0_27, %c0_28] : memref<1x128xbf16, #tpu.memory_space<vmem>>, vector<1x128xbf16>
    %37 = vector.broadcast %36 : vector<1x128xbf16> to vector<256x128xbf16>
    %38 = arith.addf %35, %37 : vector<256x128xbf16>
    %cst_29 = arith.constant 0.000000e+00 : bf16
    %39 = vector.broadcast %cst_29 : bf16 to vector<256x128xbf16>
    %40 = arith.maximumf %38, %39 : vector<256x128xbf16>
    %c0_30 = arith.constant 0 : index
    %c0_31 = arith.constant 0 : index
    %41 = vector.load %arg12[%c0_30, %c0_31] : memref<128x128xbf16, #tpu.memory_space<vmem>>, vector<128x128xbf16>
    %cst_32 = arith.constant dense<0.000000e+00> : vector<256x128xf32>
    %42 = tpu.matmul %40, %41, %cst_32 {dimension_numbers = #tpu.dot_dimension_numbers<[1], [0], [0], [1], [0, 0, 1, 1], [], []>} : vector<256x128xbf16>, vector<128x128xbf16>, vector<256x128xf32> -> vector<256x128xf32>
    %c0_33 = arith.constant 0 : index
    %c0_34 = arith.constant 0 : index
    %43 = vector.load %arg13[%c0_33, %c0_34] : memref<1x128xf32, #tpu.memory_space<vmem>>, vector<1x128xf32>
    %44 = vector.broadcast %43 : vector<1x128xf32> to vector<256x128xf32>
    %45 = arith.addf %42, %44 : vector<256x128xf32>
    %46 = arith.negf %45 : vector<256x128xf32>
    %47 = math.exp %46 : vector<256x128xf32>
    %cst_35 = arith.constant 1.000000e+00 : f32
    %48 = vector.broadcast %cst_35 : f32 to vector<256x128xf32>
    %49 = arith.addf %48, %47 : vector<256x128xf32>
    %50 = arith.divf %48, %49 : vector<256x128xf32>
    %51 = arith.truncf %50 : vector<256x128xf32> to vector<256x128xbf16>
    %c0_36 = arith.constant 0 : index
    %c0_37 = arith.constant 0 : index
    %52 = vector.load %arg14[%c0_36, %c0_37] : memref<256x128xbf16, #tpu.memory_space<vmem>>, vector<256x128xbf16>
    tpu.vector_store %arg14[%c0_36, %c0_37], %51 {strides = array<i32>} : memref<256x128xbf16, #tpu.memory_space<vmem>>, vector<256x128xbf16>,
    return
  }
  func.func @transform_0(%arg0: i32) -> (i32, i32) {
    %c0_i32 = arith.constant 0 : i32
    %c0_i32_0 = arith.constant 0 : i32
    return %arg0, %c0_i32 : i32, i32
  }
  func.func @transform_1(%arg0: i32) -> (i32, i32) {
    %c0_i32 = arith.constant 0 : i32
    %c0_i32_0 = arith.constant 0 : i32
    %c0_i32_1 = arith.constant 0 : i32
    return %c0_i32, %c0_i32_0 : i32, i32
  }
  func.func @transform_2(%arg0: i32) -> (i32, i32) {
    %c0_i32 = arith.constant 0 : i32
    %c0_i32_0 = arith.constant 0 : i32
    %c0_i32_1 = arith.constant 0 : i32
    return %c0_i32, %c0_i32_0 : i32, i32
  }
  func.func @transform_3(%arg0: i32) -> (i32, i32) {
    %c0_i32 = arith.constant 0 : i32
    %c0_i32_0 = arith.constant 0 : i32
    %c0_i32_1 = arith.constant 0 : i32
    return %c0_i32, %c0_i32_0 : i32, i32
  }
  func.func @transform_4(%arg0: i32) -> (i32, i32) {
    %c0_i32 = arith.constant 0 : i32
    %c0_i32_0 = arith.constant 0 : i32
    %c0_i32_1 = arith.constant 0 : i32
    return %c0_i32, %c0_i32_0 : i32, i32
  }
  func.func @transform_5(%arg0: i32) -> (i32, i32) {
    %c0_i32 = arith.constant 0 : i32
    %c0_i32_0 = arith.constant 0 : i32
    %c0_i32_1 = arith.constant 0 : i32
    return %c0_i32, %c0_i32_0 : i32, i32
  }
  func.func @transform_6(%arg0: i32) -> (i32, i32) {
    %c0_i32 = arith.constant 0 : i32
    %c0_i32_0 = arith.constant 0 : i32
    %c0_i32_1 = arith.constant 0 : i32
    return %c0_i32, %c0_i32_0 : i32, i32
  }
  func.func @transform_7(%arg0: i32) -> (i32, i32) {
    %c0_i32 = arith.constant 0 : i32
    %c0_i32_0 = arith.constant 0 : i32
    %c0_i32_1 = arith.constant 0 : i32
    return %c0_i32, %c0_i32_0 : i32, i32
  }
  func.func @transform_8(%arg0: i32) -> (i32, i32) {
    %c0_i32 = arith.constant 0 : i32
    %c0_i32_0 = arith.constant 0 : i32
    %c0_i32_1 = arith.constant 0 : i32
    return %c0_i32, %c0_i32_0 : i32, i32
  }
  func.func @transform_9(%arg0: i32) -> (i32, i32) {
    %c0_i32 = arith.constant 0 : i32
    %c0_i32_0 = arith.constant 0 : i32
    %c0_i32_1 = arith.constant 0 : i32
    return %c0_i32, %c0_i32_0 : i32, i32
  }
  func.func @transform_10(%arg0: i32) -> (i32, i32) {
    %c0_i32 = arith.constant 0 : i32
    %c0_i32_0 = arith.constant 0 : i32
    %c0_i32_1 = arith.constant 0 : i32
    return %c0_i32, %c0_i32_0 : i32, i32
  }
  func.func @transform_11(%arg0: i32) -> (i32, i32) {
    %c0_i32 = arith.constant 0 : i32
    %c0_i32_0 = arith.constant 0 : i32
    %c0_i32_1 = arith.constant 0 : i32
    return %c0_i32, %c0_i32_0 : i32, i32
  }
  func.func @transform_12(%arg0: i32) -> (i32, i32) {
    %c0_i32 = arith.constant 0 : i32
    %c0_i32_0 = arith.constant 0 : i32
    %c0_i32_1 = arith.constant 0 : i32
    return %c0_i32, %c0_i32_0 : i32, i32
  }
  func.func @transform_13(%arg0: i32) -> (i32, i32) {
    %c0_i32 = arith.constant 0 : i32
    %c0_i32_0 = arith.constant 0 : i32
    return %arg0, %c0_i32 : i32, i32
  }
}

</mosaic_0001>

<bundles_post_ra>
// kernel: mlp_forward.1
= control target key start
LH: loop header
LB: loop body
LE: loop exit
PB: predicated region body
PF: predicated region fallthrough
CT: control target
= control target key end

     0   :  { %s5031_s25 = smov 0   ;;  %s6310_s0 = inlined_call_operand.vmem [shape: bf16[512,128], index: 0, kind: input, shape index: {}]   ;;  %s6311_s1 = inlined_call_operand.vmem [shape: bf16[128,512], index: 1, kind: input, shape index: {}]   ;;  %s6312_s2 = inlined_call_operand.vmem [shape: bf16[1,512], index: 2, kind: input, shape index: {}]   ;;  %s6313_s3 = inlined_call_operand.vmem [shape: bf16[512,256], index: 3, kind: input, shape index: {}]   ;;  %s6314_s4 = inlined_call_operand.vmem [shape: bf16[1,256], index: 4, kind: input, shape index: {}]   ;;  %s6315_s5 = inlined_call_operand.vmem [shape: bf16[256,128], index: 5, kind: input, shape index: {}]   ;;  %s6316_s6 = inlined_call_operand.vmem [shape: bf16[1,128], index: 6, kind: input, shape index: {}]   ;;  %s6317_s7 = inlined_call_operand.vmem [shape: bf16[128,128], index: 7, kind: input, shape index: {}]   ;;  %s6318_s8 = inlined_call_operand.vmem [shape: bf16[1,128], index: 8, kind: input, shape index: {}]   ;;  %s6319_s9 = inlined_call_operand.vmem [shape: bf16[128,128], index: 9, kind: input, shape index: {}]   ;;  %s6320_s10 = inlined_call_operand.vmem [shape: bf16[1,128], index: 10, kind: input, shape index: {}]   ;;  %s6321_s11 = inlined_call_operand.vmem [shape: bf16[128,128], index: 11, kind: input, shape index: {}]   ;;  %s6322_s12 = inlined_call_operand.vmem [shape: f32[1,128], index: 12, kind: input, shape index: {}]   ;;  %s6323_s13 = inlined_call_operand.vmem [shape: bf16[512,128], index: 13, kind: output, shape index: {}]  }
   0x1 LB: > { %s3848_s26 = sadd.s32 4294967295, %s4957_s25   ;;  %p3852_p0 = scmp.ge.s32.totalorder %s4957_s25, 1  ;;  %s4957_s25 = sphi %s5031_s25, %s23_s25  }
   0x2   : > { %p388_p1 = scmp.lt.s32.totalorder %s4957_s25, 3 }
   0x4   : > { %p389_p2 = pnand %p3852_p0, %p388_p1 }
   0x6   : > { %392 = sbr.rel (%p389_p2) target bundleno = 1654 (0x676), region = 72 }
   0xd   : > { %v4623_v0 = vld [vmem:[%s6311_s1 + $0x4] ss:$16 sps:$4 sm:$0xff]   ;;  %s3853_s29 = sshll.u32 %s3848_s26, 5  ;;  %v4625_v1 = vld [vmem:[%s6311_s1] ss:$16 sps:$4 sm:$0xff]   ;;  %v6327_v2 = vmov 0  }
   0xe   : > { %797 = vmatprep.mubr.bf16.mxu0 %v6327_v2  ;;  %p433_p3 = scmp.lt.s32.totalorder %s3853_s29, 63  ;;  %917 = vmatprep.mubr.bf16.mxu1 %v6327_v2  ;;  %v4626_v3 = vld [vmem:[%s6311_s1 + $0x24] ss:$16 sps:$4 sm:$0xff]   ;;  %v4628_v4 = vld [vmem:[%s6311_s1 + $0x20] ss:$16 sps:$4 sm:$0xff]  }
   0xf   : > { %765 = vmatprep.subr.bf16.mxu0 %v4623_v0  ;;  %4533 = vmatprep.subr.bf16.mxu1 %v4623_v0  ;;  %v4629_v5 = vld [vmem:[%s6311_s1 + $0x44] ss:$16 sps:$4 sm:$0xff]   ;;  %v4631_v6 = vld [vmem:[%s6311_s1 + $0x40] ss:$16 sps:$4 sm:$0xff]   ;;  %v4662_v17 = vld [vmem:[%s6311_s1 + $0xc] ss:$16 sps:$4 sm:$0xff]  }
  0x10   : > { %766 = vmatpush1.bf16.msra.mxu0 %v4625_v1  ;;  %s6373_s29 = smov (!%p433_p3, %s3853_s29), 63  ;;  %4541 = vmatpush1.bf16.msra.mxu1 %v4625_v1  ;;  %v4632_v7 = vld [vmem:[%s6311_s1 + $0x64] ss:$16 sps:$4 sm:$0xff]   ;;  %v4634_v8 = vld [vmem:[%s6311_s1 + $0x60] ss:$16 sps:$4 sm:$0xff]  }
  0x11   : > { %767 = vmatprep.subr.bf16.mxu0 %v4626_v3  ;;  %4534 = vmatprep.subr.bf16.mxu1 %v4626_v3  ;;  %s3854_s21 = sshll.u32 %s6373_s29, 2  ;;  %v4635_v9 = vld [vmem:[%s6311_s1 + $0x84] ss:$16 sps:$4 sm:$0xff]   ;;  %v4637_v10 = vld [vmem:[%s6311_s1 + $0x80] ss:$16 sps:$4 sm:$0xff]  }
  0x12   : > { %s5070_s30 = scalar_lea.vmem %s6310_s0, %s3854_s21  ;;  %v4638_v11 = vld [vmem:[%s6311_s1 + $0xa4] ss:$16 sps:$4 sm:$0xff]   ;;  %v4640_v12 = vld [vmem:[%s6311_s1 + $0xa0] ss:$16 sps:$4 sm:$0xff]   ;;  %v4660_v20 = vld [vmem:[%s6311_s1 + $0x8] ss:$16 sps:$4 sm:$0xff]   ;;  %s6265_s14 = scalar_lea.vmem %s6323_s13, %s3854_s21 }
  0x13   : > { %v4641_v13 = vld [vmem:[%s6311_s1 + $0xc4] ss:$16 sps:$4 sm:$0xff]   ;;  %v4643_v14 = vld [vmem:[%s6311_s1 + $0xc0] ss:$16 sps:$4 sm:$0xff]   ;;  %v4665_v21 = vld [vmem:[%s6311_s1 + $0x2c] ss:$16 sps:$4 sm:$0xff]  }
  0x14   : > { %768 = vmatpush1.bf16.msra.mxu0 %v4628_v4  ;;  %4542 = vmatpush1.bf16.msra.mxu1 %v4628_v4  ;;  %v4644_v15 = vld [vmem:[%s6311_s1 + $0xe4] ss:$16 sps:$4 sm:$0xff]   ;;  %v4646_v16 = vld [vmem:[%s6311_s1 + $0xe0] ss:$16 sps:$4 sm:$0xff]   ;;  %v4663_v22 = vld [vmem:[%s6311_s1 + $0x28] ss:$16 sps:$4 sm:$0xff]  }
  0x15   : > { %769 = vmatprep.subr.bf16.mxu0 %v4629_v5  ;;  %4535 = vmatprep.subr.bf16.mxu1 %v4629_v5  ;;  %v5103_v18 = vld [vmem:[%s5070_s30] sm:$0xff]   ;;  %v5121_v23 = vld [vmem:[%s5070_s30 + $0x8] sm:$0xff]   ;;  %v4692_v30 = vld [vmem:[%s6313_s3 + $0x14] ss:$8 sps:$4 sm:$0xff]  }
  0x16   : > { %v5106_v19 = vld [vmem:[%s5070_s30 + $0x60] sm:$0xff]   ;;  %v4669_v24 = vld [vmem:[%s6311_s1 + $0x4c] ss:$16 sps:$4 sm:$0xff]   ;;  %v4667_v28 = vld [vmem:[%s6311_s1 + $0x48] ss:$16 sps:$4 sm:$0xff]  }
  0x17   : > { %v5128_v25 = vld [vmem:[%s5070_s30 + $0x68] sm:$0xff]   ;;  %v4690_v31 = vld [vmem:[%s6313_s3 + $0x10] ss:$8 sps:$4 sm:$0xff]   ;;  %v4698_v40 = vld [vmem:[%s6313_s3 + $0x34] ss:$8 sps:$4 sm:$0xff]  }
  0x18   : > { %770 = vmatpush1.bf16.msra.mxu0 %v4631_v6  ;;  %4543 = vmatpush1.bf16.msra.mxu1 %v4631_v6  ;;  %v4687_v26 = vld [vmem:[%s6313_s3] ss:$8 sps:$4 sm:$0xff]   ;;  %v4689_v27 = vld [vmem:[%s6313_s3 + $0x4] ss:$8 sps:$4 sm:$0xff]   ;;  %v5162_v35 = vld [vmem:[%s5070_s30 + $0x10] sm:$0xff]  }
  0x19   : > { %771 = vmatprep.subr.bf16.mxu0 %v4632_v7  ;;  %4536 = vmatprep.subr.bf16.mxu1 %v4632_v7  ;;  %v4672_v29 = vld [vmem:[%s6311_s1 + $0x6c] ss:$16 sps:$4 sm:$0xff]   ;;  %v4670_v32 = vld [vmem:[%s6311_s1 + $0x68] ss:$16 sps:$4 sm:$0xff]   ;;  %v5165_v36 = vld [vmem:[%s5070_s30 + $0x70] sm:$0xff]  }
  0x1a   : > { %v4695_v33 = vld [vmem:[%s6313_s3 + $0x24] ss:$8 sps:$4 sm:$0xff]   ;;  %v4674_v37 = vld [vmem:[%s6311_s1 + $0x88] ss:$16 sps:$4 sm:$0xff]   ;;  %v4704_v51 = vld [vmem:[%s6313_s3 + $0x54] ss:$8 sps:$4 sm:$0xff]  }
  0x1b   : > { %v4676_v34 = vld [vmem:[%s6311_s1 + $0x8c] ss:$16 sps:$4 sm:$0xff]   ;;  %v4693_v39 = vld [vmem:[%s6313_s3 + $0x20] ss:$8 sps:$4 sm:$0xff]   ;;  %v4696_v43 = vld [vmem:[%s6313_s3 + $0x30] ss:$8 sps:$4 sm:$0xff]  }
  0x1c   : > { %772 = vmatpush1.bf16.msra.mxu0 %v4634_v8  ;;  %4544 = vmatpush1.bf16.msra.mxu1 %v4634_v8  ;;  %v4679_v38 = vld [vmem:[%s6311_s1 + $0xac] ss:$16 sps:$4 sm:$0xff]   ;;  %v4677_v41 = vld [vmem:[%s6311_s1 + $0xa8] ss:$16 sps:$4 sm:$0xff]   ;;  %v4651_v52 = vld [vmem:[%s5070_s30 + $0x20] sm:$0xff]  }
  0x1d   : > { %773 = vmatprep.subr.bf16.mxu0 %v4635_v9  ;;  %4537 = vmatprep.subr.bf16.mxu1 %v4635_v9  ;;  %v4683_v42 = vld [vmem:[%s6311_s1 + $0xcc] ss:$16 sps:$4 sm:$0xff]   ;;  %v4681_v46 = vld [vmem:[%s6311_s1 + $0xc8] ss:$16 sps:$4 sm:$0xff]   ;;  %v4653_v62 = vld [vmem:[%s5070_s30 + $0x30] sm:$0xff]  }
  0x1e   : > { %v5193_v44 = vld [vmem:[%s5070_s30 + $0x18] sm:$0xff]   ;;  %v4699_v48 = vld [vmem:[%s6313_s3 + $0x40] ss:$8 sps:$4 sm:$0xff]   ;;  %v4701_v49 = vld [vmem:[%s6313_s3 + $0x44] ss:$8 sps:$4 sm:$0xff]  }
  0x1f   : > { %v5196_v45 = vld [vmem:[%s5070_s30 + $0x78] sm:$0xff]   ;;  %v4707_v54 = vld [vmem:[%s6313_s3 + $0x64] ss:$8 sps:$4 sm:$0xff]   ;;  %v4705_v55 = vld [vmem:[%s6313_s3 + $0x60] ss:$8 sps:$4 sm:$0xff]  }
  0x20   : > { %774 = vmatpush1.bf16.msra.mxu0 %v4637_v10  ;;  %4545 = vmatpush1.bf16.msra.mxu1 %v4637_v10  ;;  %v4686_v47 = vld [vmem:[%s6311_s1 + $0xec] ss:$16 sps:$4 sm:$0xff]   ;;  %v4684_v50 = vld [vmem:[%s6311_s1 + $0xe8] ss:$16 sps:$4 sm:$0xff]   ;;  %v4655_v9 = vld [vmem:[%s5070_s30 + $0x40] sm:$0xff]  }
  0x21   : > { %775 = vmatprep.subr.bf16.mxu0 %v4638_v11  ;;  %4538 = vmatprep.subr.bf16.mxu1 %v4638_v11  ;;  %v4702_v53 = vld [vmem:[%s6313_s3 + $0x50] ss:$8 sps:$4 sm:$0xff]   ;;  %v4710_v56 = vld [vmem:[%s6313_s3 + $0x74] ss:$8 sps:$4 sm:$0xff]   ;;  %v4652_v57 = vld [vmem:[%s5070_s30 + $0x28] sm:$0xff]  }
  0x22   : > { %v4708_v58 = vld [vmem:[%s6313_s3 + $0x70] ss:$8 sps:$4 sm:$0xff]   ;;  %v4713_v59 = vld [vmem:[%s6313_s3 + $0x84] ss:$8 sps:$4 sm:$0xff]   ;;  %v4711_v60 = vld [vmem:[%s6313_s3 + $0x80] ss:$8 sps:$4 sm:$0xff]  }
  0x23   : > { %v4716_v61 = vld [vmem:[%s6313_s3 + $0x94] ss:$8 sps:$4 sm:$0xff]   ;;  %v4714_v63 = vld [vmem:[%s6313_s3 + $0x90] ss:$8 sps:$4 sm:$0xff]   ;;  %v4719_v0 = vld [vmem:[%s6313_s3 + $0xa4] ss:$8 sps:$4 sm:$0xff]  }
  0x24   : > { %776 = vmatpush1.bf16.msra.mxu0 %v4640_v12  ;;  %4546 = vmatpush1.bf16.msra.mxu1 %v4640_v12  ;;  %v4717_v1 = vld [vmem:[%s6313_s3 + $0xa0] ss:$8 sps:$4 sm:$0xff]   ;;  %v4722_v3 = vld [vmem:[%s6313_s3 + $0xb4] ss:$8 sps:$4 sm:$0xff]   ;;  %v4720_v5 = vld [vmem:[%s6313_s3 + $0xb0] ss:$8 sps:$4 sm:$0xff]  }
  0x25   : > { %777 = vmatprep.subr.bf16.mxu0 %v4641_v13  ;;  %4539 = vmatprep.subr.bf16.mxu1 %v4641_v13  ;;  %v4654_v4 = vld [vmem:[%s5070_s30 + $0x38] sm:$0xff]   ;;  %v4725_v6 = vld [vmem:[%s6313_s3 + $0xc4] ss:$8 sps:$4 sm:$0xff]   ;;  %v4723_v7 = vld [vmem:[%s6313_s3 + $0xc0] ss:$8 sps:$4 sm:$0xff]  }
  0x26   : > { %v4728_v8 = vld [vmem:[%s6313_s3 + $0xd4] ss:$8 sps:$4 sm:$0xff]   ;;  %v4726_v10 = vld [vmem:[%s6313_s3 + $0xd0] ss:$8 sps:$4 sm:$0xff]   ;;  %v4731_v11 = vld [vmem:[%s6313_s3 + $0xe4] ss:$8 sps:$4 sm:$0xff]  }
  0x27   : > { %v4729_v12 = vld [vmem:[%s6313_s3 + $0xe0] ss:$8 sps:$4 sm:$0xff]  }
  0x28   : > { %778 = vmatpush1.bf16.msra.mxu0 %v4643_v14  ;;  %4547 = vmatpush1.bf16.msra.mxu1 %v4643_v14  ;;  %v4656_v13 = vld [vmem:[%s5070_s30 + $0x48] sm:$0xff]   ;;  %v4657_v14 = vld [vmem:[%s5070_s30 + $0x50] sm:$0xff]  }
  0x29   : > { %779 = vmatprep.subr.bf16.mxu0 %v4644_v15  ;;  %4540 = vmatprep.subr.bf16.mxu1 %v4644_v15  ;;  %v4658_v15 = vld [vmem:[%s5070_s30 + $0x58] sm:$0xff]  }
  0x2c   : > { %780 = vmatpush1.bf16.msra.mxu0 %v4646_v16  ;;  %4548 = vmatpush1.bf16.msra.mxu1 %v4646_v16  ;;  %v4734_v16 = vld [vmem:[%s6313_s3 + $0xf4] ss:$8 sps:$4 sm:$0xff]  }
  0x2d   : > { %958 = vmatprep.subr.bf16.mxu1 %v4662_v17  ;;  %1781 = vmatprep.subr.bf16.mxu0 %v4689_v27  ;;  %v4732_v17 = vld [vmem:[%s6313_s3 + $0xf0] ss:$8 sps:$4 sm:$0xff]  }
  0x2f   : > { %798 = vmatmul.mubr.bf16.vlgmr.msra.gmra.mrb[0].mxu0 %v5103_v18  ;;  %918 = vmatmul.mubr.bf16.vlgmr.msra.gmra.mrb[0].mxu1 %v5106_v19 }
  0x30   : > { %807 = vmatprep.mubr.bf16.mxu0 %v6327_v2  ;;  %959 = vmatpush1.bf16.msra.mxu1 %v4660_v20  ;;  %v4960_v20 = vmov 1966171168  }
  0x31   : > { %960 = vmatprep.subr.bf16.mxu1 %v4665_v21  ;;  %927 = vmatprep.mubr.bf16.mxu1 %v6327_v2  ;;  %v1226_v21 = vunpack.c.l.s4 %v4960_v20 }
  0x32   : > { %1782 = vmatpush1.bf16.msra.mxu0 %v4687_v26 }
  0x33   : > { %1783 = vmatprep.subr.bf16.mxu0 %v4692_v30 }
  0x34   : > { %961 = vmatpush1.bf16.msra.mxu1 %v4663_v22  ;;  %v1228_v22 = vlaneseq }
  0x35   : > { %962 = vmatprep.subr.bf16.mxu1 %v4669_v24 }
  0x36   : > { %1784 = vmatpush1.bf16.msra.mxu0 %v4690_v31  ;;  %v1229_v24 = vshrl.u32 %v1228_v22, 7 }
  0x37   : > { %808 = vmatmul.mubr.bf16.gmra.mrb[4].mxu0 %v5121_v23  ;;  %928 = vmatmul.mubr.bf16.gmra.mrb[4].mxu1 %v5128_v25 }
  0x38   : > { %817 = vmatprep.mubr.bf16.mxu0 %v6327_v2  ;;  %963 = vmatpush1.bf16.msra.mxu1 %v4667_v28  ;;  %v5337_v30 = vsub.s32 0, %v1229_v24 }
  0x39   : > { %964 = vmatprep.subr.bf16.mxu1 %v4672_v29  ;;  %937 = vmatprep.mubr.bf16.mxu1 %v6327_v2 }
  0x3a   : > { %1785 = vmatprep.subr.bf16.mxu0 %v4695_v33 }
  0x3b   : > { %1786 = vmatpush1.bf16.msra.mxu0 %v4693_v39 }
  0x3c   : > { %965 = vmatpush1.bf16.msra.mxu1 %v4670_v32  ;;  %1787 = vmatprep.subr.bf16.mxu0 %v4698_v40 }
  0x3d   : > { %966 = vmatprep.subr.bf16.mxu1 %v4676_v34 }
  0x3f   : > { %818 = vmatmul.mubr.bf16.gmra.mrb[8].mxu0 %v5162_v35  ;;  %938 = vmatmul.mubr.bf16.gmra.mrb[8].mxu1 %v5165_v36 }
  0x40   : > { %827 = vmatprep.mubr.bf16.mxu0 %v6327_v2  ;;  %967 = vmatpush1.bf16.msra.mxu1 %v4674_v37 }
  0x41   : > { %968 = vmatprep.subr.bf16.mxu1 %v4679_v38  ;;  %947 = vmatprep.mubr.bf16.mxu1 %v6327_v2 }
  0x42   : > { %1788 = vmatpush1.bf16.msra.mxu0 %v4696_v43 }
  0x43   : > { %1789 = vmatprep.subr.bf16.mxu0 %v4701_v49 }
  0x44   : > { %969 = vmatpush1.bf16.msra.mxu1 %v4677_v41 }
  0x45   : > { %970 = vmatprep.subr.bf16.mxu1 %v4683_v42 }
  0x46   : > { %1790 = vmatpush1.bf16.msra.mxu0 %v4699_v48 }
  0x47   : > { %828 = vmatmul.mubr.bf16.gmra.mrb[12].mxu0 %v5193_v44  ;;  %948 = vmatmul.mubr.bf16.gmra.mrb[12].mxu1 %v5196_v45 }
  0x48   : > { %837 = vmatprep.mubr.bf16.mxu0 %v6327_v2  ;;  %971 = vmatpush1.bf16.msra.mxu1 %v4681_v46 }
  0x49   : > { %972 = vmatprep.subr.bf16.mxu1 %v4686_v47  ;;  %990 = vmatprep.mubr.bf16.mxu1 %v6327_v2 }
  0x4a   : > { %1791 = vmatprep.subr.bf16.mxu0 %v4704_v51 }
  0x4b   : > { %1792 = vmatpush1.bf16.msra.mxu0 %v4702_v53 }
  0x4c   : > { %973 = vmatpush1.bf16.msra.mxu1 %v4684_v50  ;;  %1793 = vmatprep.subr.bf16.mxu0 %v4707_v54  ;;  %v4735_v50 = vld [vmem:[%s6313_s3 + $0x100] ss:$8 sps:$4 sm:$0xff]   ;;  %v4740_v54 = vld [vmem:[%s6313_s3 + $0x114] ss:$8 sps:$4 sm:$0xff]  }
  0x4f   : > { %838 = vmatmul.mubr.bf16.gmra.mrb[16].mxu0 %v4651_v52  ;;  %991 = vmatmul.mubr.bf16.vlgmr.msra.gmra.mrb[16].mxu1 %v5103_v18  ;;  %v4737_v18 = vld [vmem:[%s6313_s3 + $0x104] ss:$8 sps:$4 sm:$0xff]  }
  0x50   : > { %847 = vmatprep.mubr.bf16.mxu0 %v6327_v2  ;;  %1000 = vmatprep.mubr.bf16.mxu1 %v6327_v2 }
  0x51   : > { %1794 = vmatpush1.bf16.msra.mxu0 %v4705_v55 }
  0x52   : > { %1795 = vmatprep.subr.bf16.mxu0 %v4710_v56 }
  0x55   : > { %1796 = vmatpush1.bf16.msra.mxu0 %v4708_v58 }
  0x56   : > { %1797 = vmatprep.subr.bf16.mxu0 %v4713_v59 }
  0x57   : > { %848 = vmatmul.mubr.bf16.gmra.mrb[20].mxu0 %v4652_v57  ;;  %1001 = vmatmul.mubr.bf16.gmra.mrb[20].mxu1 %v5121_v23  ;;  %v1227_v23 = vunpack.c.0.s8 %v1226_v21  ;;  %v4744_v21 = vld [vmem:[%s6313_s3 + $0x130] ss:$8 sps:$4 sm:$0xff]  }
  0x58   : > { %857 = vmatprep.mubr.bf16.mxu0 %v6327_v2  ;;  %1010 = vmatprep.mubr.bf16.mxu1 %v6327_v2 }
  0x59   : > { %1798 = vmatpush1.bf16.msra.mxu0 %v4711_v60  ;;  %v5327_v26 = vsub.s32 %v1227_v23, %v1229_v24  ;;  %v4749_v24 = vld [vmem:[%s6313_s3 + $0x144] ss:$8 sps:$4 sm:$0xff]  }
  0x5a   : > { %1799 = vmatprep.subr.bf16.mxu0 %v4716_v61 }
  0x5b   : > { %6330 = vst [vmem:[#allocation2_spill] sm:$0xff] %v5327_v26 }
  0x5d   : > { %1800 = vmatpush1.bf16.msra.mxu0 %v4714_v63  ;;  %v4738_v63 = vld [vmem:[%s6313_s3 + $0x110] ss:$8 sps:$4 sm:$0xff]  }
  0x5e   : > { %1801 = vmatprep.subr.bf16.mxu0 %v4719_v0 }
  0x5f   : > { %858 = vmatmul.mubr.bf16.gmra.mrb[24].mxu0 %v4653_v62  ;;  %1011 = vmatmul.mubr.bf16.gmra.mrb[24].mxu1 %v5162_v35 }
  0x60   : > { %867 = vmatprep.mubr.bf16.mxu0 %v6327_v2  ;;  %1020 = vmatprep.mubr.bf16.mxu1 %v6327_v2 }
  0x61   : > { %1802 = vmatpush1.bf16.msra.mxu0 %v4717_v1 }
  0x62   : > { %1803 = vmatprep.subr.bf16.mxu0 %v4722_v3  ;;  %v4743_v3 = vld [vmem:[%s6313_s3 + $0x124] ss:$8 sps:$4 sm:$0xff]  }
  0x65   : > { %1804 = vmatpush1.bf16.msra.mxu0 %v4720_v5 }
  0x66   : > { %1805 = vmatprep.subr.bf16.mxu0 %v4725_v6 }
  0x67   : > { %868 = vmatmul.mubr.bf16.gmra.mrb[28].mxu0 %v4654_v4  ;;  %1021 = vmatmul.mubr.bf16.gmra.mrb[28].mxu1 %v5193_v44 }
  0x68   : > { %877 = vmatprep.mubr.bf16.mxu0 %v6327_v2  ;;  %1030 = vmatprep.mubr.bf16.mxu1 %v6327_v2 }
  0x69   : > { %1806 = vmatpush1.bf16.msra.mxu0 %v4723_v7  ;;  %v4741_v7 = vld [vmem:[%s6313_s3 + $0x120] ss:$8 sps:$4 sm:$0xff]  }
  0x6a   : > { %1807 = vmatprep.subr.bf16.mxu0 %v4728_v8 }
  0x6d   : > { %1808 = vmatpush1.bf16.msra.mxu0 %v4726_v10 }
  0x6e   : > { %1809 = vmatprep.subr.bf16.mxu0 %v4731_v11  ;;  %v4746_v11 = vld [vmem:[%s6313_s3 + $0x134] ss:$8 sps:$4 sm:$0xff]  }
  0x6f   : > { %878 = vmatmul.mubr.bf16.gmra.mrb[32].mxu0 %v4655_v9  ;;  %1031 = vmatmul.mubr.bf16.gmra.mrb[32].mxu1 %v4651_v52 }
  0x70   : > { %887 = vmatprep.mubr.bf16.mxu0 %v6327_v2  ;;  %1040 = vmatprep.mubr.bf16.mxu1 %v6327_v2 }
  0x71   : > { %1810 = vmatpush1.bf16.msra.mxu0 %v4729_v12 }
  0x72   : > { %1811 = vmatprep.subr.bf16.mxu0 %v4734_v16 }
  0x75   : > { %1812 = vmatpush1.bf16.msra.mxu0 %v4732_v17 }
  0x76   : > { %1974 = vmatprep.subr.bf16.mxu0 %v4737_v18 }
  0x77   : > { %888 = vmatmul.mubr.bf16.gmra.mrb[36].mxu0 %v4656_v13  ;;  %1041 = vmatmul.mubr.bf16.gmra.mrb[36].mxu1 %v4652_v57 }
  0x78   : > { %897 = vmatprep.mubr.bf16.mxu0 %v6327_v2  ;;  %1050 = vmatprep.mubr.bf16.mxu1 %v6327_v2 }
  0x7f   : > { %898 = vmatmul.mubr.bf16.gmra.mrb[40].mxu0 %v4657_v14  ;;  %1051 = vmatmul.mubr.bf16.gmra.mrb[40].mxu1 %v4653_v62 }
  0x80   : > { %907 = vmatprep.mubr.bf16.mxu0 %v6327_v2  ;;  %1060 = vmatprep.mubr.bf16.mxu1 %v6327_v2 }
  0x87   : > { %908 = vmatmul.mubr.bf16.gmra.mrb[44].mxu0 %v4658_v15  ;;  %1061 = vmatmul.mubr.bf16.gmra.mrb[44].mxu1 %v4654_v4 }
  0x88   : > { %1070 = vmatprep.mubr.bf16.mxu1 %v6327_v2 }
  0x8f   : > { %1071 = vmatmul.mubr.bf16.gmra.mrb[48].mxu1 %v4655_v9 }
  0x90   : > { %1080 = vmatprep.mubr.bf16.mxu1 %v6327_v2 }
  0x97   : > { %1081 = vmatmul.mubr.bf16.gmra.mrb[52].mxu1 %v4656_v13 }
  0x98   : > { %1090 = vmatprep.mubr.bf16.mxu1 %v6327_v2 }
  0x9f   : > { %1091 = vmatmul.mubr.bf16.gmra.mrb[56].mxu1 %v4657_v14 }
  0xa0   : > { %1100 = vmatprep.mubr.bf16.mxu1 %v6327_v2 }
  0xa7   : > { %1101 = vmatmul.mubr.bf16.gmra.mrb[60].mxu1 %v4658_v15 }
  0xa8   : > { %1110 = vmatprep.mubr.bf16.mxu1 %v6327_v2 }
  0xaf   : > { %1111 = vmatmul.mubr.bf16.gmra.mrb[64].mxu1 %v5106_v19  ;;  %v3905_v19 = vld.sshfl [vmem:[%s6312_s2] sm:$0x33 pattern:$0x75316420] }
  0xb0   : > { %1120 = vmatprep.mubr.bf16.mxu1 %v6327_v2  ;;  %v5330_v27 = vrot.slane %v3905_v19, %v5327_v26 }
  0xb2   : > { %v1242_v29 = vpack.i.b16 %v5330_v27, %v5330_v27 }
  0xb4   : > { %v5344_v35 = vrot.slane %v1242_v29, %v5337_v30 }
  0xb7   : > { %1121 = vmatmul.mubr.bf16.gmra.mrb[68].mxu1 %v5128_v25  ;;  %v1224_v25 = vcombine.high %v3905_v19, %v3905_v19 }
  0xb8   : > { %1130 = vmatprep.mubr.bf16.mxu1 %v6327_v2 }
  0xb9   : > { %v5333_v28 = vrot.slane %v1224_v25, %v5327_v26 }
  0xbb   : > { %v1249_v31 = vpack.i.b16 %v5333_v28, %v5333_v28 }
  0xbd   : > { %v5349_v38 = vrot.slane %v1249_v31, %v5337_v30  ;;  %v4747_v31 = vld [vmem:[%s6313_s3 + $0x140] ss:$8 sps:$4 sm:$0xff]  }
  0xbf   : > { %1131 = vmatmul.mubr.bf16.gmra.mrb[72].mxu1 %v5165_v36 }
  0xc0   : > { %1140 = vmatprep.mubr.bf16.mxu1 %v6327_v2 }
  0xc7   : > { %1141 = vmatmul.mubr.bf16.gmra.mrb[76].mxu1 %v5196_v45 }
 0x102   : > { %v799_v32 = vpop.f32.mrb[0].mxu0  ;;  %v5341_v33 = vpop.f32.mrb[0].mxu1 }
 0x103   : > { %v801_v34 = vpop.f32.mrb[1].mxu0  ;;  %v5346_v36 = vpop.f32.mrb[1].mxu1 }
 0x104   : > { %v803_v37 = vpop.f32.mrb[2].mxu0  ;;  %v5351_v39 = vpop.f32.mrb[2].mxu1 }
 0x105   : > { %v1151_v40 = vpack.c.bf16 %v803_v37, %v799_v32  ;;  %v805_v41 = vpop.f32.mrb[3].mxu0  ;;  %v5355_v43 = vpop.f32.mrb[3].mxu1 }
 0x106   : > { %v1152_v44 = vpack.c.bf16 %v805_v41, %v801_v34 }
 0x107   : > { %v1269_v46 = vadd.bf16 %v5344_v35, %v1151_v40  ;;  %v4752_v40 = vld [vmem:[%s6313_s3 + $0x154] ss:$8 sps:$4 sm:$0xff]  }
 0x108   : > { %v1270_v47 = vadd.bf16 %v5349_v38, %v1152_v44 }
 0x109   : > { %v1333_v52 = vmax.bf16 %v6327_v2, %v1269_v46 }
 0x10a   : > { %v809_v48 = vpop.f32.mrb[4].mxu0  ;;  %v1334_v49 = vmax.bf16 %v6327_v2, %v1270_v47  ;;  %v5365_v51 = vpop.f32.mrb[4].mxu1 }
 0x10b   : > { %v811_v53 = vpop.f32.mrb[5].mxu0  ;;  %v5371_v55 = vpop.f32.mrb[5].mxu1 }
 0x10c   : > { %v813_v56 = vpop.f32.mrb[6].mxu0  ;;  %1813 = vmatprep.mubr.bf16.mxu0 %v1334_v49  ;;  %v5373_v57 = vpop.f32.mrb[6].mxu1 }
 0x10d   : > { %v1155_v58 = vpack.c.bf16 %v813_v56, %v809_v48  ;;  %v815_v59 = vpop.f32.mrb[7].mxu0  ;;  %1814 = vmatmul.mubr.bf16.vlgmr.msra.gmra.mrb[48].mxu0 %v1333_v52  ;;  %v5377_v61 = vpop.f32.mrb[7].mxu1 }
 0x10e   : > { %v1156_v62 = vpack.c.bf16 %v815_v59, %v811_v53  ;;  %1975 = vmatpush1.bf16.msra.mxu0 %v4735_v50  ;;  %v4750_v53 = vld [vmem:[%s6313_s3 + $0x150] ss:$8 sps:$4 sm:$0xff]  }
 0x10f   : > { %v1273_v1 = vadd.bf16 %v5344_v35, %v1155_v58  ;;  %1976 = vmatprep.subr.bf16.mxu0 %v4740_v54  ;;  %v4755_v58 = vld [vmem:[%s6313_s3 + $0x164] ss:$8 sps:$4 sm:$0xff]  }
 0x110   : > { %v1274_v4 = vadd.bf16 %v5349_v38, %v1156_v62 }
 0x111   : > { %v1337_v10 = vmax.bf16 %v6327_v2, %v1273_v1  ;;  %v4753_v1 = vld [vmem:[%s6313_s3 + $0x160] ss:$8 sps:$4 sm:$0xff]  }
 0x112   : > { %v819_v5 = vpop.f32.mrb[8].mxu0  ;;  %v1338_v6 = vmax.bf16 %v6327_v2, %v1274_v4  ;;  %1977 = vmatpush1.bf16.msra.mxu0 %v4738_v63  ;;  %v5393_v8 = vpop.f32.mrb[8].mxu1 }
 0x113   : > { %v821_v9 = vpop.f32.mrb[9].mxu0  ;;  %1978 = vmatprep.subr.bf16.mxu0 %v4743_v3  ;;  %v5399_v12 = vpop.f32.mrb[9].mxu1 }
 0x114   : > { %v823_v13 = vpop.f32.mrb[10].mxu0  ;;  %1823 = vmatprep.mubr.bf16.mxu0 %v1338_v6  ;;  %v5401_v14 = vpop.f32.mrb[10].mxu1  ;;  %v4758_v6 = vld [vmem:[%s6313_s3 + $0x174] ss:$8 sps:$4 sm:$0xff]  }
 0x115   : > { %v1159_v15 = vpack.c.bf16 %v823_v13, %v819_v5  ;;  %v825_v16 = vpop.f32.mrb[11].mxu0  ;;  %1824 = vmatmul.mubr.bf16.gmra.mrb[52].mxu0 %v1337_v10  ;;  %v5405_v18 = vpop.f32.mrb[11].mxu1 }
 0x116   : > { %v1160_v20 = vpack.c.bf16 %v825_v16, %v821_v9  ;;  %1979 = vmatpush1.bf16.msra.mxu0 %v4741_v7 }
 0x117   : > { %v1277_v23 = vadd.bf16 %v5344_v35, %v1159_v15  ;;  %1980 = vmatprep.subr.bf16.mxu0 %v4746_v11 }
 0x118   : > { %v1278_v19 = vadd.bf16 %v5349_v38, %v1160_v20 }
 0x119   : > { %v1341_v37 = vmax.bf16 %v6327_v2, %v1277_v23 }
 0x11a   : > { %v829_v25 = vpop.f32.mrb[12].mxu0  ;;  %v1342_v29 = vmax.bf16 %v6327_v2, %v1278_v19  ;;  %1981 = vmatpush1.bf16.msra.mxu0 %v4744_v21  ;;  %v5421_v32 = vpop.f32.mrb[12].mxu1  ;;  %v4756_v21 = vld [vmem:[%s6313_s3 + $0x170] ss:$8 sps:$4 sm:$0xff]   ;;  %v4761_v19 = vld [vmem:[%s6313_s3 + $0x184] ss:$8 sps:$4 sm:$0xff]  }
 0x11b   : > { %v831_v34 = vpop.f32.mrb[13].mxu0  ;;  %1982 = vmatprep.subr.bf16.mxu0 %v4749_v24  ;;  %v5427_v41 = vpop.f32.mrb[13].mxu1 }
 0x11c   : > { %v833_v44 = vpop.f32.mrb[14].mxu0  ;;  %1833 = vmatprep.mubr.bf16.mxu0 %v1342_v29  ;;  %v5429_v46 = vpop.f32.mrb[14].mxu1 }
 0x11d   : > { %v1163_v47 = vpack.c.bf16 %v833_v44, %v829_v25  ;;  %v835_v48 = vpop.f32.mrb[15].mxu0  ;;  %1834 = vmatmul.mubr.bf16.gmra.mrb[56].mxu0 %v1341_v37  ;;  %v5433_v50 = vpop.f32.mrb[15].mxu1 }
 0x11e   : > { %v1164_v52 = vpack.c.bf16 %v835_v48, %v831_v34  ;;  %1983 = vmatpush1.bf16.msra.mxu0 %v4747_v31  ;;  %v4759_v34 = vld [vmem:[%s6313_s3 + $0x180] ss:$8 sps:$4 sm:$0xff]  }
 0x11f   : > { %v1281_v56 = vadd.bf16 %v5344_v35, %v1163_v47  ;;  %1984 = vmatprep.subr.bf16.mxu0 %v4752_v40  ;;  %v4764_v47 = vld [vmem:[%s6313_s3 + $0x194] ss:$8 sps:$4 sm:$0xff]  }
 0x120   : > { %v1282_v59 = vadd.bf16 %v5349_v38, %v1164_v52 }
 0x121   : > { %v1345_v5 = vmax.bf16 %v6327_v2, %v1281_v56 }
 0x122   : > { %v839_v62 = vpop.f32.mrb[16].mxu0  ;;  %v1346_v63 = vmax.bf16 %v6327_v2, %v1282_v59  ;;  %1985 = vmatpush1.bf16.msra.mxu0 %v4750_v53  ;;  %v5449_v3 = vpop.f32.mrb[16].mxu1 }
 0x123   : > { %v841_v4 = vpop.f32.mrb[17].mxu0  ;;  %1986 = vmatprep.subr.bf16.mxu0 %v4755_v58  ;;  %v5455_v7 = vpop.f32.mrb[17].mxu1 }
 0x124   : > { %v843_v9 = vpop.f32.mrb[18].mxu0  ;;  %1843 = vmatprep.mubr.bf16.mxu0 %v1346_v63  ;;  %v5457_v10 = vpop.f32.mrb[18].mxu1 }
 0x125   : > { %v1167_v11 = vpack.c.bf16 %v843_v9, %v839_v62  ;;  %v845_v13 = vpop.f32.mrb[19].mxu0  ;;  %1844 = vmatmul.mubr.bf16.gmra.mrb[60].mxu0 %v1345_v5  ;;  %v5461_v16 = vpop.f32.mrb[19].mxu1 }
 0x126   : > { %v1168_v20 = vpack.c.bf16 %v845_v13, %v841_v4  ;;  %1987 = vmatpush1.bf16.msra.mxu0 %v4753_v1  ;;  %v4762_v1 = vld [vmem:[%s6313_s3 + $0x190] ss:$8 sps:$4 sm:$0xff]  }
 0x127   : > { %v1285_v24 = vadd.bf16 %v5344_v35, %v1167_v11  ;;  %1988 = vmatprep.subr.bf16.mxu0 %v4758_v6  ;;  %v4767_v6 = vld [vmem:[%s6313_s3 + $0x1a4] ss:$8 sps:$4 sm:$0xff]  }
 0x128   : > { %v1286_v25 = vadd.bf16 %v5349_v38, %v1168_v20  ;;  %v4765_v20 = vld [vmem:[%s6313_s3 + $0x1a0] ss:$8 sps:$4 sm:$0xff]  }
 0x129   : > { %v1349_v44 = vmax.bf16 %v6327_v2, %v1285_v24 }
 0x12a   : > { %v849_v29 = vpop.f32.mrb[20].mxu0  ;;  %v1350_v31 = vmax.bf16 %v6327_v2, %v1286_v25  ;;  %1989 = vmatpush1.bf16.msra.mxu0 %v4756_v21  ;;  %v5477_v37 = vpop.f32.mrb[20].mxu1  ;;  %v4770_v25 = vld [vmem:[%s6313_s3 + $0x1b4] ss:$8 sps:$4 sm:$0xff]  }
 0x12b   : > { %v851_v40 = vpop.f32.mrb[21].mxu0  ;;  %1990 = vmatprep.subr.bf16.mxu0 %v4761_v19  ;;  %v5483_v48 = vpop.f32.mrb[21].mxu1 }
 0x12c   : > { %v853_v52 = vpop.f32.mrb[22].mxu0  ;;  %1853 = vmatprep.mubr.bf16.mxu0 %v1350_v31  ;;  %v5485_v53 = vpop.f32.mrb[22].mxu1 }
 0x12d   : > { %v1171_v56 = vpack.c.bf16 %v853_v52, %v849_v29  ;;  %v855_v58 = vpop.f32.mrb[23].mxu0  ;;  %1854 = vmatmul.mubr.bf16.gmra.mrb[64].mxu0 %v1349_v44  ;;  %v5489_v62 = vpop.f32.mrb[23].mxu1 }
 0x12e   : > { %v1172_v63 = vpack.c.bf16 %v855_v58, %v851_v40  ;;  %1991 = vmatpush1.bf16.msra.mxu0 %v4759_v34  ;;  %v4768_v58 = vld [vmem:[%s6313_s3 + $0x1b0] ss:$8 sps:$4 sm:$0xff]  }
 0x12f   : > { %v1289_v5 = vadd.bf16 %v5344_v35, %v1171_v56  ;;  %1992 = vmatprep.subr.bf16.mxu0 %v4764_v47 }
 0x130   : > { %v1290_v9 = vadd.bf16 %v5349_v38, %v1172_v63 }
 0x131   : > { %v1353_v19 = vmax.bf16 %v6327_v2, %v1289_v5  ;;  %v4773_v5 = vld [vmem:[%s6313_s3 + $0x1c4] ss:$8 sps:$4 sm:$0xff]  }
 0x132   : > { %v859_v11 = vpop.f32.mrb[24].mxu0  ;;  %v1354_v13 = vmax.bf16 %v6327_v2, %v1290_v9  ;;  %1993 = vmatpush1.bf16.msra.mxu0 %v4762_v1  ;;  %v5505_v21 = vpop.f32.mrb[24].mxu1 }
 0x133   : > { %v861_v24 = vpop.f32.mrb[25].mxu0  ;;  %1994 = vmatprep.subr.bf16.mxu0 %v4767_v6  ;;  %v5511_v29 = vpop.f32.mrb[25].mxu1 }
 0x134   : > { %v863_v31 = vpop.f32.mrb[26].mxu0  ;;  %1863 = vmatprep.mubr.bf16.mxu0 %v1354_v13  ;;  %v5513_v34 = vpop.f32.mrb[26].mxu1  ;;  %v4771_v13 = vld [vmem:[%s6313_s3 + $0x1c0] ss:$8 sps:$4 sm:$0xff]  }
 0x135   : > { %v1175_v40 = vpack.c.bf16 %v863_v31, %v859_v11  ;;  %v865_v44 = vpop.f32.mrb[27].mxu0  ;;  %1864 = vmatmul.mubr.bf16.gmra.mrb[68].mxu0 %v1353_v19  ;;  %v5517_v52 = vpop.f32.mrb[27].mxu1 }
 0x136   : > { %v1176_v56 = vpack.c.bf16 %v865_v44, %v861_v24  ;;  %1995 = vmatpush1.bf16.msra.mxu0 %v4765_v20 }
 0x137   : > { %v1293_v1 = vadd.bf16 %v5344_v35, %v1175_v40  ;;  %1996 = vmatprep.subr.bf16.mxu0 %v4770_v25  ;;  %v4776_v25 = vld [vmem:[%s6313_s3 + $0x1d4] ss:$8 sps:$4 sm:$0xff]  }
 0x138   : > { %v1294_v6 = vadd.bf16 %v5349_v38, %v1176_v56 }
 0x139   : > { %v1357_v19 = vmax.bf16 %v6327_v2, %v1293_v1 }
 0x13a   : > { %v869_v9 = vpop.f32.mrb[28].mxu0  ;;  %v1358_v11 = vmax.bf16 %v6327_v2, %v1294_v6  ;;  %1997 = vmatpush1.bf16.msra.mxu0 %v4768_v58  ;;  %v5533_v20 = vpop.f32.mrb[28].mxu1 }
 0x13b   : > { %v871_v24 = vpop.f32.mrb[29].mxu0  ;;  %1998 = vmatprep.subr.bf16.mxu0 %v4773_v5  ;;  %v5539_v31 = vpop.f32.mrb[29].mxu1  ;;  %v4774_v5 = vld [vmem:[%s6313_s3 + $0x1d0] ss:$8 sps:$4 sm:$0xff]  }
 0x13c   : > { %v873_v40 = vpop.f32.mrb[30].mxu0  ;;  %1873 = vmatprep.mubr.bf16.mxu0 %v1358_v11  ;;  %v5541_v44 = vpop.f32.mrb[30].mxu1 }
 0x13d   : > { %v1179_v56 = vpack.c.bf16 %v873_v40, %v869_v9  ;;  %v875_v58 = vpop.f32.mrb[31].mxu0  ;;  %1874 = vmatmul.mubr.bf16.gmra.mrb[72].mxu0 %v1357_v19  ;;  %v5545_v47 = vpop.f32.mrb[31].mxu1  ;;  %v4779_v9 = vld [vmem:[%s6313_s3 + $0x1e4] ss:$8 sps:$4 sm:$0xff]  }
 0x13e   : > { %v1180_v1 = vpack.c.bf16 %v875_v58, %v871_v24  ;;  %1999 = vmatpush1.bf16.msra.mxu0 %v4771_v13  ;;  %v4777_v13 = vld [vmem:[%s6313_s3 + $0x1e0] ss:$8 sps:$4 sm:$0xff]  }
 0x13f   : > { %v1297_v11 = vadd.bf16 %v5344_v35, %v1179_v56  ;;  %2000 = vmatprep.subr.bf16.mxu0 %v4776_v25  ;;  %v4782_v25 = vld [vmem:[%s6313_s3 + $0x1f4] ss:$8 sps:$4 sm:$0xff]  }
 0x140   : > { %v1298_v19 = vadd.bf16 %v5349_v38, %v1180_v1 }
 0x141   : > { %v1361_v56 = vmax.bf16 %v6327_v2, %v1297_v11 }
 0x142   : > { %v879_v40 = vpop.f32.mrb[32].mxu0  ;;  %v1362_v24 = vmax.bf16 %v6327_v2, %v1298_v19  ;;  %2001 = vmatpush1.bf16.msra.mxu0 %v4774_v5  ;;  %v5561_v58 = vpop.f32.mrb[32].mxu1 }
 0x143   : > { %v881_v6 = vpop.f32.mrb[33].mxu0  ;;  %2002 = vmatprep.subr.bf16.mxu0 %v4779_v9  ;;  %v5567_v59 = vpop.f32.mrb[33].mxu1  ;;  %v4780_v9 = vld [vmem:[%s6313_s3 + $0x1f0] ss:$8 sps:$4 sm:$0xff]  }
 0x144   : > { %v883_v1 = vpop.f32.mrb[34].mxu0  ;;  %1883 = vmatprep.mubr.bf16.mxu0 %v1362_v24  ;;  %v5569_v19 = vpop.f32.mrb[34].mxu1 }
 0x145   : > { %v1183_v5 = vpack.c.bf16 %v883_v1, %v879_v40  ;;  %v885_v63 = vpop.f32.mrb[35].mxu0  ;;  %1884 = vmatmul.mubr.bf16.gmra.mrb[76].mxu0 %v1361_v56  ;;  %v5573_v4 = vpop.f32.mrb[35].mxu1 }
 0x146   : > { %v1184_v11 = vpack.c.bf16 %v885_v63, %v881_v6  ;;  %2003 = vmatpush1.bf16.msra.mxu0 %v4777_v13 }
 0x147   : > { %v1301_v24 = vadd.bf16 %v5344_v35, %v1183_v5  ;;  %2004 = vmatprep.subr.bf16.mxu0 %v4782_v25 }
 0x148   : > { %v1302_v40 = vadd.bf16 %v5349_v38, %v1184_v11 }
 0x149   : > { %v1365_v6 = vmax.bf16 %v6327_v2, %v1301_v24 }
 0x14a   : > { %v889_v56 = vpop.f32.mrb[36].mxu0  ;;  %v1366_v1 = vmax.bf16 %v6327_v2, %v1302_v40  ;;  %2005 = vmatpush1.bf16.msra.mxu0 %v4780_v9  ;;  %v5583_v15 = vpop.f32.mrb[36].mxu1 }
 0x14b   : > { %v891_v63 = vpop.f32.mrb[37].mxu0  ;;  %v5586_v13 = vpop.f32.mrb[37].mxu1 }
 0x14c   : > { %v893_v23 = vpop.f32.mrb[38].mxu0  ;;  %1893 = vmatprep.mubr.bf16.mxu0 %v1366_v1  ;;  %v5588_v17 = vpop.f32.mrb[38].mxu1 }
 0x14d   : > { %v1187_v49 = vpack.c.bf16 %v893_v23, %v889_v56  ;;  %v895_v5 = vpop.f32.mrb[39].mxu0  ;;  %1894 = vmatmul.mubr.bf16.gmra.mrb[80].mxu0 %v1365_v6  ;;  %v5592_v11 = vpop.f32.mrb[39].mxu1 }
 0x14e   : > { %v1188_v9 = vpack.c.bf16 %v895_v5, %v891_v63 }
 0x14f   : > { %v1305_v24 = vadd.bf16 %v5344_v35, %v1187_v49 }
 0x150   : > { %v1306_v54 = vadd.bf16 %v5349_v38, %v1188_v9 }
 0x151   : > { %v1369_v56 = vmax.bf16 %v6327_v2, %v1305_v24 }
 0x152   : > { %v899_v60 = vpop.f32.mrb[40].mxu0  ;;  %v1370_v1 = vmax.bf16 %v6327_v2, %v1306_v54  ;;  %v5599_v22 = vpop.f32.mrb[40].mxu1 }
 0x153   : > { %6331 = vst [vmem:[#allocation3_spill] sm:$0xff] %v5599_v22  ;;  %v901_v23 = vpop.f32.mrb[41].mxu0  ;;  %v5602_v6 = vpop.f32.mrb[41].mxu1  ;;  %v6333_v22 = vpack.c.bf16 %v5355_v43, %v5346_v36 }
 0x154   : > { %v903_v25 = vpop.f32.mrb[42].mxu0  ;;  %1903 = vmatprep.mubr.bf16.mxu0 %v1370_v1  ;;  %v5604_v63 = vpop.f32.mrb[42].mxu1 }
 0x155   : > { %6332 = vst [vmem:[#allocation4_spill] sm:$0xff] %v5604_v63  ;;  %v1191_v5 = vpack.c.bf16 %v903_v25, %v899_v60  ;;  %v905_v40 = vpop.f32.mrb[43].mxu0  ;;  %1904 = vmatmul.mubr.bf16.gmra.mrb[84].mxu0 %v1369_v56  ;;  %v5608_v9 = vpop.f32.mrb[43].mxu1 }
 0x156   : > { %v1192_v54 = vpack.c.bf16 %v905_v40, %v901_v23 }
 0x157   : > { %v1309_v24 = vadd.bf16 %v5344_v35, %v1191_v5 }
 0x158   : > { %v1310_v0 = vadd.bf16 %v5349_v38, %v1192_v54 }
 0x159   : > { %v1373_v25 = vmax.bf16 %v6327_v2, %v1309_v24  ;;  %v1318_v24 = vadd.bf16 %v5349_v38, %v6333_v22 }
 0x15a   : > { %v909_v45 = vpop.f32.mrb[44].mxu0  ;;  %v1374_v1 = vmax.bf16 %v6327_v2, %v1310_v0  ;;  %v5615_v26 = vpop.f32.mrb[44].mxu1 }
 0x15b   : > { %v911_v60 = vpop.f32.mrb[45].mxu0  ;;  %v5618_v56 = vpop.f32.mrb[45].mxu1 }
 0x15c   : > { %v913_v49 = vpop.f32.mrb[46].mxu0  ;;  %1913 = vmatprep.mubr.bf16.mxu0 %v1374_v1  ;;  %v5620_v40 = vpop.f32.mrb[46].mxu1 }
 0x15d   : > { %v1195_v23 = vpack.c.bf16 %v913_v49, %v909_v45  ;;  %v915_v42 = vpop.f32.mrb[47].mxu0  ;;  %1914 = vmatmul.mubr.bf16.gmra.mrb[88].mxu0 %v1373_v25  ;;  %v5624_v54 = vpop.f32.mrb[47].mxu1  ;;  %v6334_v49 = vmov 0  }
 0x15e   : > { %v1196_v0 = vpack.c.bf16 %v915_v42, %v911_v60  ;;  %v1382_v63 = vmax.bf16 %v6334_v49, %v1318_v24 }
 0x15f   : > { %v1313_v1 = vadd.bf16 %v5344_v35, %v1195_v23  ;;  %v6335_v23 = vpack.c.bf16 %v5377_v61, %v5371_v55 }
 0x160   : > { %v1314_v45 = vadd.bf16 %v5349_v38, %v1196_v0 }
 0x161   : > { %v1377_v42 = vmax.bf16 %v6334_v49, %v1313_v1  ;;  %v1322_v0 = vadd.bf16 %v5349_v38, %v6335_v23  ;;  %v4783_v1 = vld [vmem:[%s6315_s5 + $0x40] sm:$0xff]  }
 0x162   : > { %v1378_v25 = vmax.bf16 %v6334_v49, %v1314_v45  ;;  %v5636_v5 = vpop.f32.mrb[48].mxu1  ;;  %v4784_v45 = vld [vmem:[%s6315_s5] sm:$0xff]   ;;  %4205 = vmatprep.subr.bf16.mxu1 %v4783_v1  ;;  %v6338_v1 = vpack.c.bf16 %v5373_v57, %v5365_v51  ;;  %v6339_v57 = vpack.c.bf16 %v5433_v50, %v5427_v41 }
 0x163   : > { %v5639_v60 = vpop.f32.mrb[49].mxu1  ;;  %4206 = vmatpush3.bf16.msra.mxu1 %v4784_v45  ;;  %v1386_v55 = vmax.bf16 %v6334_v49, %v1322_v0 }
 0x164   : > { %1923 = vmatprep.mubr.bf16.mxu0 %v1378_v25  ;;  %v5641_v36 = vpop.f32.mrb[50].mxu1  ;;  %v6336_v25 = vpack.c.bf16 %v5351_v39, %v5341_v33  ;;  %v6337_v33 = vpack.c.bf16 %v5405_v18, %v5399_v12  ;;  %v1321_v45 = vadd.bf16 %v5344_v35, %v6338_v1 }
 0x165   : > { %1924 = vmatmul.mubr.bf16.gmra.mrb[92].mxu0 %v1377_v42  ;;  %v5645_v22 = vpop.f32.mrb[51].mxu1 }
 0x166   : > { %1933 = vmatprep.mubr.bf16.mxu0 %v1382_v63  ;;  %v1317_v63 = vadd.bf16 %v5344_v35, %v6336_v25  ;;  %v1326_v39 = vadd.bf16 %v5349_v38, %v6337_v33 }
 0x168   : > { %v1381_v42 = vmax.bf16 %v6334_v49, %v1317_v63  ;;  %v1390_v25 = vmax.bf16 %v6334_v49, %v1326_v39  ;;  %v1240_v63 = vcombine.high %v5333_v28, %v5333_v28  ;;  %v1330_v28 = vadd.bf16 %v5349_v38, %v6339_v57 }
 0x169   : > { %v1239_v57 = vcombine.high %v5330_v27, %v5330_v27  ;;  %v6342_v27 = vpack.c.bf16 %v5429_v46, %v5421_v32 }
 0x16a   : > { %v5664_v61 = vpop.f32.mrb[52].mxu1  ;;  %v1263_v39 = vpack.i.b16 %v1240_v63, %v1240_v63  ;;  %v1394_v38 = vmax.bf16 %v6334_v49, %v1330_v28  ;;  %v6341_v28 = vpack.c.bf16 %v5461_v16, %v5455_v7 }
 0x16b   : > { %v5667_v23 = vpop.f32.mrb[53].mxu1 }
 0x16c   : > { %v5669_v43 = vpop.f32.mrb[54].mxu1  ;;  %v5717_v41 = vrot.slane %v1263_v39, %v5337_v30 }
 0x16d   : > { %1934 = vmatmul.mubr.bf16.gmra.mrb[96].mxu0 %v1381_v42  ;;  %v5673_v2 = vpop.f32.mrb[55].mxu1 }
 0x16e   : > { %1943 = vmatprep.mubr.bf16.mxu0 %v1386_v55  ;;  %v1190_v0 = vpack.c.bf16 %v5673_v2, %v5667_v23  ;;  %v1385_v55 = vmax.bf16 %v6334_v49, %v1321_v45  ;;  %v4785_v45 = vld [vmem:[%s6315_s5 + $0x48] sm:$0xff]   ;;  %v1272_v39 = vadd.bf16 %v5717_v41, %v6341_v28  ;;  %v6363_v2 = vpack.c.bf16 %v5669_v43, %v5664_v61 }
 0x16f   : > { %4207 = vmatprep.subr.bf16.mxu1 %v4785_v45  ;;  %v1329_v45 = vadd.bf16 %v5344_v35, %v6342_v27  ;;  %v6343_v27 = vpack.c.bf16 %v5489_v62, %v5483_v48  ;;  %v4791_v48 = vld [vmem:[%s6315_s5 + $0x60] sm:$0xff]  }
 0x171   : > { %v1393_v7 = vmax.bf16 %v6334_v49, %v1329_v45  ;;  %v1276_v45 = vadd.bf16 %v5717_v41, %v6343_v27 }
 0x172   : > { %v5688_v42 = vpop.f32.mrb[56].mxu1 }
 0x173   : > { %v5691_v12 = vpop.f32.mrb[57].mxu1  ;;  %v1340_v62 = vmax.bf16 %v6334_v49, %v1276_v45  ;;  %v6345_v45 = vpack.c.bf16 %v5517_v52, %v5511_v29  ;;  %v4795_v29 = vld [vmem:[%s6315_s5 + $0x70] sm:$0xff]  }
 0x174   : > { %v5693_v18 = vpop.f32.mrb[58].mxu1 }
 0x175   : > { %1944 = vmatmul.mubr.bf16.gmra.mrb[100].mxu0 %v1385_v55  ;;  %v5697_v51 = vpop.f32.mrb[59].mxu1  ;;  %v4786_v55 = vld [vmem:[%s6315_s5 + $0x8] sm:$0xff]  }
 0x176   : > { %1953 = vmatprep.mubr.bf16.mxu0 %v1390_v25  ;;  %v6340_v25 = vpack.c.bf16 %v5401_v14, %v5393_v8  ;;  %4208 = vmatpush3.bf16.msra.mxu1 %v4786_v55  ;;  %v1256_v55 = vpack.i.b16 %v1239_v57, %v1239_v57  ;;  %v4788_v57 = vld [vmem:[%s6315_s5 + $0x10] sm:$0xff]   ;;  %v4790_v8 = vld [vmem:[%s6315_s5 + $0x18] sm:$0xff]  }
 0x178   : > { %v1325_v33 = vadd.bf16 %v5344_v35, %v6340_v25  ;;  %v1336_v25 = vmax.bf16 %v6334_v49, %v1272_v39  ;;  %v4787_v35 = vld [vmem:[%s6315_s5 + $0x50] sm:$0xff]   ;;  %v4789_v39 = vld [vmem:[%s6315_s5 + $0x58] sm:$0xff]  }
 0x179   : > { %4209 = vmatprep.subr.bf16.mxu1 %v4787_v35  ;;  %v4792_v35 = vld [vmem:[%s6315_s5 + $0x20] sm:$0xff]  }
 0x17a   : > { %v5719_v50 = vpop.f32.mrb[60].mxu1  ;;  %v1389_v63 = vmax.bf16 %v6334_v49, %v1325_v33  ;;  %4210 = vmatpush3.bf16.msra.mxu1 %v4788_v57 }
 0x17b   : > { %v5724_v24 = vpop.f32.mrb[61].mxu1  ;;  %4211 = vmatprep.subr.bf16.mxu1 %v4789_v39 }
 0x17c   : > { %v5726_v1 = vpop.f32.mrb[62].mxu1 }
 0x17d   : > { %1954 = vmatmul.mubr.bf16.gmra.mrb[104].mxu0 %v1389_v63  ;;  %v5730_v14 = vpop.f32.mrb[63].mxu1 }
 0x17e   : > { %1963 = vmatprep.mubr.bf16.mxu0 %v1394_v38  ;;  %v1198_v33 = vpack.c.bf16 %v5730_v14, %v5724_v24  ;;  %v5746_v38 = vrot.slane %v1256_v55, %v5337_v30  ;;  %4212 = vmatpush3.bf16.msra.mxu1 %v4790_v8  ;;  %v1280_v8 = vadd.bf16 %v5717_v41, %v6345_v45 }
 0x17f   : > { %4213 = vmatprep.subr.bf16.mxu1 %v4791_v48  ;;  %v4794_v48 = vld [vmem:[%s6315_s5 + $0x28] sm:$0xff]   ;;  %v6366_v24 = vpack.c.bf16 %v5726_v1, %v5719_v50 }
 0x180   : > { %v1344_v52 = vmax.bf16 %v6334_v49, %v1280_v8  ;;  %v6347_v8 = vpack.c.bf16 %v5545_v47, %v5539_v31  ;;  %v1307_v23 = vadd.bf16 %v5746_v38, %v6363_v2 }
 0x181   : > { %v1315_v14 = vadd.bf16 %v5746_v38, %v6366_v24 }
 0x182   : > { %v5743_v63 = vpop.f32.mrb[64].mxu1  ;;  %4214 = vmatpush3.bf16.msra.mxu1 %v4792_v35 }
 0x183   : > { %v5749_v16 = vpop.f32.mrb[65].mxu1 }
 0x184   : > { %v5751_v28 = vpop.f32.mrb[66].mxu1 }
 0x185   : > { %1964 = vmatmul.mubr.bf16.gmra.mrb[108].mxu0 %v1393_v7  ;;  %v5755_v46 = vpop.f32.mrb[67].mxu1  ;;  %v6344_v7 = vpack.c.bf16 %v5457_v10, %v5449_v3 }
 0x186   : > { %2006 = vmatprep.mubr.bf16.mxu0 %v1336_v25 }
 0x187   : > { %v1271_v32 = vadd.bf16 %v5746_v38, %v6344_v7 }
 0x189   : > { %v1335_v27 = vmax.bf16 %v6334_v49, %v1271_v32  ;;  %v4793_v32 = vld [vmem:[%s6315_s5 + $0x68] sm:$0xff]  }
 0x18a   : > { %v5783_v25 = vpop.f32.mrb[68].mxu1  ;;  %4215 = vmatprep.subr.bf16.mxu1 %v4793_v32 }
 0x18b   : > { %v5786_v3 = vpop.f32.mrb[69].mxu1  ;;  %4216 = vmatpush3.bf16.msra.mxu1 %v4794_v48 }
 0x18c   : > { %v5788_v10 = vpop.f32.mrb[70].mxu1  ;;  %4217 = vmatprep.subr.bf16.mxu1 %v4795_v29  ;;  %v4798_v29 = vld [vmem:[%s6315_s5 + $0x38] sm:$0xff]  }
 0x18d   : > { %2007 = vmatmul.mubr.bf16.vlgmr.msra.gmra.mrb[48].mxu0 %v1335_v27  ;;  %v5795_v39 = vpop.f32.mrb[71].mxu1  ;;  %v6346_v27 = vpack.c.bf16 %v5485_v53, %v5477_v37  ;;  %v4796_v53 = vld [vmem:[%s6315_s5 + $0x30] sm:$0xff]  }
 0x18e   : > { %2016 = vmatprep.mubr.bf16.mxu0 %v1340_v62 }
 0x18f   : > { %v1275_v57 = vadd.bf16 %v5746_v38, %v6346_v27  ;;  %v1284_v27 = vadd.bf16 %v5717_v41, %v6347_v8  ;;  %4218 = vmatpush3.bf16.msra.mxu1 %v4796_v53  ;;  %v6349_v53 = vpack.c.bf16 %v5573_v4, %v5567_v59  ;;  %v6352_v4 = vpack.c.bf16 %v5569_v19, %v5561_v58 }
 0x191   : > { %v1339_v45 = vmax.bf16 %v6334_v49, %v1275_v57  ;;  %v4797_v57 = vld [vmem:[%s6315_s5 + $0x78] sm:$0xff]  }
 0x192   : > { %v5817_v62 = vpop.f32.mrb[72].mxu1  ;;  %4219 = vmatprep.subr.bf16.mxu1 %v4797_v57  ;;  %v1288_v57 = vadd.bf16 %v5717_v41, %v6349_v53  ;;  %v1287_v53 = vadd.bf16 %v5746_v38, %v6352_v4 }
 0x193   : > { %v5820_v7 = vpop.f32.mrb[73].mxu1  ;;  %4220 = vmatpush3.bf16.msra.mxu1 %v4798_v29 }
 0x194   : > { %v5822_v37 = vpop.f32.mrb[74].mxu1  ;;  %v1352_v29 = vmax.bf16 %v6334_v49, %v1288_v57  ;;  %v6353_v57 = vpack.c.bf16 %v5608_v9, %v5602_v6  ;;  %v6357_v6 = vld [vmem:[#allocation3_spill] sm:$0xff] }
 0x195   : > { %2017 = vmatmul.mubr.bf16.gmra.mrb[52].mxu0 %v1339_v45  ;;  %v5829_v32 = vpop.f32.mrb[75].mxu1  ;;  %v6348_v45 = vpack.c.bf16 %v5513_v34, %v5505_v21 }
 0x196   : > { %2026 = vmatprep.mubr.bf16.mxu0 %v1344_v52  ;;  %v1210_v48 = vpack.c.bf16 %v5829_v32, %v5820_v7  ;;  %v1348_v52 = vmax.bf16 %v6334_v49, %v1284_v27  ;;  %v6350_v27 = vpack.c.bf16 %v5541_v44, %v5533_v20  ;;  %v1351_v44 = vmax.bf16 %v6334_v49, %v1287_v53 }
 0x197   : > { %v1279_v35 = vadd.bf16 %v5746_v38, %v6348_v45  ;;  %v6370_v7 = vpack.c.bf16 %v5822_v37, %v5817_v62  ;;  %v6371_v37 = vld [vmem:[#allocation2_spill] sm:$0xff] }
 0x198   : > { %v1283_v45 = vadd.bf16 %v5746_v38, %v6350_v27  ;;  %v1296_v27 = vadd.bf16 %v5717_v41, %v6353_v57  ;;  %v6362_v57 = vpack.c.bf16 %v5697_v51, %v5691_v12  ;;  %v6364_v12 = vpack.c.bf16 %v5693_v18, %v5688_v42 }
 0x199   : > { %v1343_v47 = vmax.bf16 %v6334_v49, %v1279_v35  ;;  %v1379_v18 = vmax.bf16 %v6334_v49, %v1315_v14  ;;  %v1327_v32 = vadd.bf16 %v5746_v38, %v6370_v7 }
 0x19a   : > { %v5848_v55 = vpop.f32.mrb[76].mxu1  ;;  %v1360_v58 = vmax.bf16 %v6334_v49, %v1296_v27  ;;  %v1312_v27 = vadd.bf16 %v5717_v41, %v6362_v57  ;;  %v1311_v51 = vadd.bf16 %v5746_v38, %v6364_v12  ;;  %v4802_v12 = vld [vmem:[%s6317_s7 + $0x18] sm:$0xff]  }
 0x19b   : > { %v5851_v31 = vpop.f32.mrb[77].mxu1 }
 0x19c   : > { %v5853_v8 = vpop.f32.mrb[78].mxu1  ;;  %v1375_v61 = vmax.bf16 %v6334_v49, %v1311_v51 }
 0x19d   : > { %2027 = vmatmul.mubr.bf16.gmra.mrb[56].mxu0 %v1343_v47  ;;  %v1213_v21 = vpack.c.bf16 %v5853_v8, %v5848_v55  ;;  %v5857_v34 = vpop.f32.mrb[79].mxu1  ;;  %v1347_v47 = vmax.bf16 %v6334_v49, %v1283_v45  ;;  %v6355_v45 = vpack.c.bf16 %v5624_v54, %v5618_v56  ;;  %v6360_v56 = vpack.c.bf16 %v5620_v40, %v5615_v26 }
 0x19e   : > { %2036 = vmatprep.mubr.bf16.mxu0 %v1348_v52  ;;  %v1214_v35 = vpack.c.bf16 %v5857_v34, %v5851_v31  ;;  %v6351_v52 = vpack.c.bf16 %v5592_v11, %v5586_v13  ;;  %v6354_v13 = vpack.c.bf16 %v5588_v17, %v5583_v15 }
 0x19f   : > { %v1299_v54 = vadd.bf16 %v5746_v38, %v6360_v56 }
 0x1a0   : > { %v1292_v59 = vadd.bf16 %v5717_v41, %v6351_v52  ;;  %v1291_v11 = vadd.bf16 %v5746_v38, %v6354_v13  ;;  %v6365_v13 = vpack.c.bf16 %v5755_v46, %v5749_v16  ;;  %v6368_v16 = vpack.c.bf16 %v5751_v28, %v5743_v63 }
 0x1a2   : > { %v1356_v20 = vmax.bf16 %v6334_v49, %v1292_v59  ;;  %v1355_v19 = vmax.bf16 %v6334_v49, %v1291_v11  ;;  %v6359_v59 = vpack.c.bf16 %v5645_v22, %v5639_v60  ;;  %v6361_v60 = vpack.c.bf16 %v5641_v36, %v5636_v5 }
 0x1a3   : > { %v1376_v5 = vmax.bf16 %v6334_v49, %v1312_v27  ;;  %v1371_v36 = vmax.bf16 %v6334_v49, %v1307_v23  ;;  %v1320_v11 = vadd.bf16 %v5717_v41, %v6365_v13  ;;  %v1319_v46 = vadd.bf16 %v5746_v38, %v6368_v16  ;;  %v4801_v27 = vld [vmem:[%s6317_s7 + $0x10] sm:$0xff]  }
 0x1a4   : > { %v1304_v4 = vadd.bf16 %v5717_v41, %v6359_v59  ;;  %v1303_v22 = vadd.bf16 %v5746_v38, %v6361_v60 }
 0x1a5   : > { %2037 = vmatmul.mubr.bf16.gmra.mrb[60].mxu0 %v1347_v47  ;;  %v6356_v47 = vld [vmem:[#allocation4_spill] sm:$0xff]  ;;  %v1384_v42 = vmax.bf16 %v6334_v49, %v1320_v11  ;;  %v1383_v50 = vmax.bf16 %v6334_v49, %v1319_v46 }
 0x1a6   : > { %2046 = vmatprep.mubr.bf16.mxu0 %v1352_v29  ;;  %v1300_v29 = vadd.bf16 %v5717_v41, %v6355_v45  ;;  %v6358_v9 = vpack.c.bf16 %v6356_v47, %v6357_v6  ;;  %v1368_v53 = vmax.bf16 %v6334_v49, %v1304_v4  ;;  %v1367_v40 = vmax.bf16 %v6334_v49, %v1303_v22 }
 0x1a7   : > { %v1332_v45 = vadd.bf16 %v5717_v41, %v1214_v35 }
 0x1a8   : > { %v1295_v52 = vadd.bf16 %v5746_v38, %v6358_v9  ;;  %v1364_v17 = vmax.bf16 %v6334_v49, %v1300_v29 }
 0x1aa   : > { %v1359_v15 = vmax.bf16 %v6334_v49, %v1295_v52 }
 0x1ad   : > { %2047 = vmatmul.mubr.bf16.gmra.mrb[64].mxu0 %v1351_v44  ;;  %v1308_v44 = vadd.bf16 %v5717_v41, %v1190_v0  ;;  %v1316_v0 = vadd.bf16 %v5717_v41, %v1198_v33  ;;  %v6367_v33 = vpack.c.bf16 %v5795_v39, %v5786_v3  ;;  %v6369_v3 = vpack.c.bf16 %v5788_v10, %v5783_v25 }
 0x1ae   : > { %2056 = vmatprep.mubr.bf16.mxu0 %v1356_v20  ;;  %v1363_v20 = vmax.bf16 %v6334_v49, %v1299_v54  ;;  %v1396_v25 = vmax.bf16 %v6334_v49, %v1332_v45  ;;  %v1391_v10 = vmax.bf16 %v6334_v49, %v1327_v32 }
 0x1af   : > { %v1372_v26 = vmax.bf16 %v6334_v49, %v1308_v44  ;;  %v1380_v43 = vmax.bf16 %v6334_v49, %v1316_v0  ;;  %v1323_v39 = vadd.bf16 %v5746_v38, %v6369_v3  ;;  %v4800_v44 = vld [vmem:[%s6317_s7 + $0x8] sm:$0xff]  }
 0x1b1   : > { %v1387_v28 = vmax.bf16 %v6334_v49, %v1323_v39 }
 0x1b5   : > { %2057 = vmatmul.mubr.bf16.gmra.mrb[68].mxu0 %v1355_v19  ;;  %v1328_v19 = vadd.bf16 %v5717_v41, %v1210_v48  ;;  %v1331_v48 = vadd.bf16 %v5746_v38, %v1213_v21 }
 0x1b6   : > { %2066 = vmatprep.mubr.bf16.mxu0 %v1360_v58  ;;  %v1324_v58 = vadd.bf16 %v5717_v41, %v6367_v33  ;;  %v3970_v41 = vld.sshfl [vmem:[%s6314_s4] sm:$0x11 pattern:$0x75316420] }
 0x1b7   : > { %v1392_v63 = vmax.bf16 %v6334_v49, %v1328_v19  ;;  %v1395_v31 = vmax.bf16 %v6334_v49, %v1331_v48  ;;  %v2208_v62 = vcombine.high %v3970_v41, %v3970_v41  ;;  %v2215_v34 = vrot.slane %v3970_v41, %v6371_v37 }
 0x1b8   : > { %v1388_v1 = vmax.bf16 %v6334_v49, %v1324_v58 }
 0x1b9   : > { %v2222_v35 = vrot.slane %v2208_v62, %v6371_v37  ;;  %v2224_v29 = vpack.i.b16 %v2215_v34, %v2215_v34 }
 0x1bb   : > { %v2231_v47 = vpack.i.b16 %v2222_v35, %v2222_v35  ;;  %v5992_v55 = vrot.slane %v2224_v29, %v5337_v30 }
 0x1bd   : > { %2067 = vmatmul.mubr.bf16.gmra.mrb[72].mxu0 %v1359_v15  ;;  %v5995_v8 = vrot.slane %v2231_v47, %v5337_v30 }
 0x1be   : > { %2076 = vmatprep.mubr.bf16.mxu0 %v1364_v17  ;;  %v4799_v17 = vld [vmem:[%s6317_s7] sm:$0xff]  }
 0x1bf   : > { %4389 = vmatprep.subr.bf16.mxu1 %v4799_v17 }
 0x1c5   : > { %2077 = vmatmul.mubr.bf16.gmra.mrb[76].mxu0 %v1363_v20 }
 0x1c6   : > { %2086 = vmatprep.mubr.bf16.mxu0 %v1368_v53 }
 0x1cd   : > { %2087 = vmatmul.mubr.bf16.gmra.mrb[80].mxu0 %v1367_v40 }
 0x1ce   : > { %2096 = vmatprep.mubr.bf16.mxu0 %v1372_v26 }
 0x1d5   : > { %2097 = vmatmul.mubr.bf16.gmra.mrb[84].mxu0 %v1371_v36 }
 0x1d6   : > { %2106 = vmatprep.mubr.bf16.mxu0 %v1376_v5 }
 0x1dd   : > { %2107 = vmatmul.mubr.bf16.gmra.mrb[88].mxu0 %v1375_v61 }
 0x1de   : > { %2116 = vmatprep.mubr.bf16.mxu0 %v1380_v43 }
 0x1e5   : > { %2117 = vmatmul.mubr.bf16.gmra.mrb[92].mxu0 %v1379_v18 }
 0x1e6   : > { %2126 = vmatprep.mubr.bf16.mxu0 %v1384_v42 }
 0x1ed   : > { %2127 = vmatmul.mubr.bf16.gmra.mrb[96].mxu0 %v1383_v50 }
 0x1ee   : > { %2136 = vmatprep.mubr.bf16.mxu0 %v1388_v1 }
 0x1f5   : > { %2137 = vmatmul.mubr.bf16.gmra.mrb[100].mxu0 %v1387_v28 }
 0x1f6   : > { %2146 = vmatprep.mubr.bf16.mxu0 %v1392_v63 }
 0x1fd   : > { %2147 = vmatmul.mubr.bf16.gmra.mrb[104].mxu0 %v1391_v10 }
 0x1fe   : > { %2156 = vmatprep.mubr.bf16.mxu0 %v1396_v25 }
 0x205   : > { %2157 = vmatmul.mubr.bf16.gmra.mrb[108].mxu0 %v1395_v31 }
 0x260   : > { %v2008_v6 = vpop.f32.mrb[48].mxu0 }
 0x261   : > { %v2010_v9 = vpop.f32.mrb[49].mxu0 }
 0x262   : > { %v2012_v38 = vpop.f32.mrb[50].mxu0 }
 0x263   : > { %v2167_v21 = vpack.c.bf16 %v2012_v38, %v2008_v6  ;;  %v2014_v52 = vpop.f32.mrb[51].mxu0 }
 0x264   : > { %v2168_v15 = vpack.c.bf16 %v2014_v52, %v2010_v9 }
 0x265   : > { %v2237_v59 = vadd.bf16 %v5992_v55, %v2167_v21 }
 0x266   : > { %v2238_v4 = vadd.bf16 %v5995_v8, %v2168_v15 }
 0x267   : > { %v2269_v53 = vmax.bf16 %v6334_v49, %v2237_v59 }
 0x268   : > { %v2018_v56 = vpop.f32.mrb[52].mxu0  ;;  %v2270_v54 = vmax.bf16 %v6334_v49, %v2238_v4 }
 0x269   : > { %v2020_v20 = vpop.f32.mrb[53].mxu0 }
 0x26a   : > { %v2022_v60 = vpop.f32.mrb[54].mxu0  ;;  %2461 = vmatprep.mubr.bf16.mxu1 %v2270_v54 }
 0x26b   : > { %v2169_v22 = vpack.c.bf16 %v2022_v60, %v2018_v56  ;;  %v2024_v26 = vpop.f32.mrb[55].mxu0  ;;  %2462 = vmatmul.mubr.bf16.vlgmr.msra.gmra.mrb[80].mxu1 %v2269_v53 }
 0x26c   : > { %v2170_v40 = vpack.c.bf16 %v2024_v26, %v2020_v20  ;;  %4390 = vmatpush3.bf16.msra.mxu1 %v4799_v17 }
 0x26d   : > { %v2239_v57 = vadd.bf16 %v5992_v55, %v2169_v22  ;;  %4391 = vmatprep.subr.bf16.mxu1 %v4800_v44 }
 0x26e   : > { %v2240_v2 = vadd.bf16 %v5995_v8, %v2170_v40 }
 0x26f   : > { %v2271_v0 = vmax.bf16 %v6334_v49, %v2239_v57 }
 0x270   : > { %v2028_v23 = vpop.f32.mrb[56].mxu0  ;;  %v2272_v5 = vmax.bf16 %v6334_v49, %v2240_v2  ;;  %4392 = vmatpush3.bf16.msra.mxu1 %v4800_v44 }
 0x271   : > { %v2030_v36 = vpop.f32.mrb[57].mxu0  ;;  %4393 = vmatprep.subr.bf16.mxu1 %v4801_v27 }
 0x272   : > { %v2032_v51 = vpop.f32.mrb[58].mxu0  ;;  %2469 = vmatprep.mubr.bf16.mxu1 %v2272_v5 }
 0x273   : > { %v2171_v43 = vpack.c.bf16 %v2032_v51, %v2028_v23  ;;  %v2034_v61 = vpop.f32.mrb[59].mxu0  ;;  %2470 = vmatmul.mubr.bf16.gmra.mrb[84].mxu1 %v2271_v0 }
 0x274   : > { %v2172_v13 = vpack.c.bf16 %v2034_v61, %v2030_v36  ;;  %4394 = vmatpush3.bf16.msra.mxu1 %v4801_v27 }
 0x275   : > { %v2241_v11 = vadd.bf16 %v5992_v55, %v2171_v43  ;;  %4395 = vmatprep.subr.bf16.mxu1 %v4802_v12 }
 0x276   : > { %v2242_v24 = vadd.bf16 %v5995_v8, %v2172_v13 }
 0x277   : > { %v2273_v33 = vmax.bf16 %v6334_v49, %v2241_v11 }
 0x278   : > { %v2038_v14 = vpop.f32.mrb[60].mxu0  ;;  %v2274_v42 = vmax.bf16 %v6334_v49, %v2242_v24  ;;  %4396 = vmatpush3.bf16.msra.mxu1 %v4802_v12 }
 0x279   : > { %v2040_v18 = vpop.f32.mrb[61].mxu0 }
 0x27a   : > { %v2042_v58 = vpop.f32.mrb[62].mxu0  ;;  %2477 = vmatprep.mubr.bf16.mxu1 %v2274_v42 }
 0x27b   : > { %v2173_v16 = vpack.c.bf16 %v2042_v58, %v2038_v14  ;;  %v2044_v46 = vpop.f32.mrb[63].mxu0  ;;  %2478 = vmatmul.mubr.bf16.gmra.mrb[88].mxu1 %v2273_v33 }
 0x27c   : > { %v2174_v1 = vpack.c.bf16 %v2044_v46, %v2040_v18 }
 0x27d   : > { %v2243_v50 = vadd.bf16 %v5992_v55, %v2173_v16 }
 0x27e   : > { %v2244_v19 = vadd.bf16 %v5995_v8, %v2174_v1 }
 0x27f   : > { %v2275_v28 = vmax.bf16 %v6334_v49, %v2243_v50 }
 0x280   : > { %v2048_v3 = vpop.f32.mrb[64].mxu0  ;;  %v2276_v39 = vmax.bf16 %v6334_v49, %v2244_v19 }
 0x281   : > { %v2050_v63 = vpop.f32.mrb[65].mxu0 }
 0x282   : > { %v2052_v45 = vpop.f32.mrb[66].mxu0  ;;  %2485 = vmatprep.mubr.bf16.mxu1 %v2276_v39 }
 0x283   : > { %v2175_v7 = vpack.c.bf16 %v2052_v45, %v2048_v3  ;;  %v2054_v32 = vpop.f32.mrb[67].mxu0  ;;  %2486 = vmatmul.mubr.bf16.gmra.mrb[92].mxu1 %v2275_v28 }
 0x284   : > { %v2176_v25 = vpack.c.bf16 %v2054_v32, %v2050_v63 }
 0x285   : > { %v2245_v10 = vadd.bf16 %v5992_v55, %v2175_v7 }
 0x286   : > { %v2246_v48 = vadd.bf16 %v5995_v8, %v2176_v25 }
 0x287   : > { %v2277_v37 = vmax.bf16 %v6334_v49, %v2245_v10 }
 0x288   : > { %v2058_v31 = vpop.f32.mrb[68].mxu0  ;;  %v2278_v41 = vmax.bf16 %v6334_v49, %v2246_v48 }
 0x289   : > { %v2060_v62 = vpop.f32.mrb[69].mxu0 }
 0x28a   : > { %v2062_v34 = vpop.f32.mrb[70].mxu0  ;;  %2493 = vmatprep.mubr.bf16.mxu1 %v2278_v41 }
 0x28b   : > { %v2177_v35 = vpack.c.bf16 %v2062_v34, %v2058_v31  ;;  %v2064_v29 = vpop.f32.mrb[71].mxu0  ;;  %2494 = vmatmul.mubr.bf16.gmra.mrb[96].mxu1 %v2277_v37 }
 0x28c   : > { %v2178_v47 = vpack.c.bf16 %v2064_v29, %v2060_v62 }
 0x28d   : > { %v2247_v6 = vadd.bf16 %v5992_v55, %v2177_v35 }
 0x28e   : > { %v2248_v9 = vadd.bf16 %v5995_v8, %v2178_v47 }
 0x28f   : > { %v2279_v17 = vmax.bf16 %v6334_v49, %v2247_v6 }
 0x290   : > { %v2068_v38 = vpop.f32.mrb[72].mxu0  ;;  %v2280_v21 = vmax.bf16 %v6334_v49, %v2248_v9 }
 0x291   : > { %v2070_v52 = vpop.f32.mrb[73].mxu0 }
 0x292   : > { %v2072_v15 = vpop.f32.mrb[74].mxu0  ;;  %2501 = vmatprep.mubr.bf16.mxu1 %v2280_v21 }
 0x293   : > { %v2179_v59 = vpack.c.bf16 %v2072_v15, %v2068_v38  ;;  %v2074_v4 = vpop.f32.mrb[75].mxu0  ;;  %2502 = vmatmul.mubr.bf16.gmra.mrb[100].mxu1 %v2279_v17 }
 0x294   : > { %v2180_v56 = vpack.c.bf16 %v2074_v4, %v2070_v52  ;;  %v4803_v52 = vld [vmem:[%s6317_s7 + $0x20] sm:$0xff]  }
 0x295   : > { %v2249_v54 = vadd.bf16 %v5992_v55, %v2179_v59  ;;  %4397 = vmatprep.subr.bf16.mxu1 %v4803_v52 }
 0x296   : > { %v2250_v53 = vadd.bf16 %v5995_v8, %v2180_v56  ;;  %4398 = vmatpush3.bf16.msra.mxu1 %v4803_v52 }
 0x297   : > { %v2281_v22 = vmax.bf16 %v6334_v49, %v2249_v54 }
 0x298   : > { %v2078_v20 = vpop.f32.mrb[76].mxu0  ;;  %v2282_v44 = vmax.bf16 %v6334_v49, %v2250_v53  ;;  %v4804_v53 = vld [vmem:[%s6317_s7 + $0x28] sm:$0xff]  }
 0x299   : > { %v2080_v60 = vpop.f32.mrb[77].mxu0  ;;  %4399 = vmatprep.subr.bf16.mxu1 %v4804_v53 }
 0x29a   : > { %v2082_v26 = vpop.f32.mrb[78].mxu0  ;;  %2509 = vmatprep.mubr.bf16.mxu1 %v2282_v44  ;;  %4400 = vmatpush3.bf16.msra.mxu1 %v4804_v53 }
 0x29b   : > { %v2181_v40 = vpack.c.bf16 %v2082_v26, %v2078_v20  ;;  %v2084_v57 = vpop.f32.mrb[79].mxu0  ;;  %2510 = vmatmul.mubr.bf16.gmra.mrb[104].mxu1 %v2281_v22  ;;  %v4805_v26 = vld [vmem:[%s6317_s7 + $0x30] sm:$0xff]  }
 0x29c   : > { %v2182_v27 = vpack.c.bf16 %v2084_v57, %v2080_v60  ;;  %4401 = vmatprep.subr.bf16.mxu1 %v4805_v26 }
 0x29d   : > { %v2251_v2 = vadd.bf16 %v5992_v55, %v2181_v40 }
 0x29e   : > { %v2252_v23 = vadd.bf16 %v5995_v8, %v2182_v27  ;;  %4402 = vmatpush3.bf16.msra.mxu1 %v4805_v26  ;;  %v4809_v26 = vld [vmem:[%s6319_s9 + $0x10] sm:$0xff]  }
 0x29f   : > { %v2283_v12 = vmax.bf16 %v6334_v49, %v2251_v2 }
 0x2a0   : > { %v2088_v5 = vpop.f32.mrb[80].mxu0  ;;  %v2284_v36 = vmax.bf16 %v6334_v49, %v2252_v23 }
 0x2a1   : > { %v2090_v0 = vpop.f32.mrb[81].mxu0 }
 0x2a2   : > { %v2092_v51 = vpop.f32.mrb[82].mxu0  ;;  %2517 = vmatprep.mubr.bf16.mxu1 %v2284_v36  ;;  %v4806_v36 = vld [vmem:[%s6317_s7 + $0x38] sm:$0xff]  }
 0x2a3   : > { %v2183_v43 = vpack.c.bf16 %v2092_v51, %v2088_v5  ;;  %v2094_v61 = vpop.f32.mrb[83].mxu0  ;;  %2518 = vmatmul.mubr.bf16.gmra.mrb[108].mxu1 %v2283_v12  ;;  %4403 = vmatprep.subr.bf16.mxu1 %v4806_v36 }
 0x2a4   : > { %v2184_v13 = vpack.c.bf16 %v2094_v61, %v2090_v0  ;;  %4404 = vmatpush3.bf16.msra.mxu1 %v4806_v36  ;;  %v4810_v36 = vld [vmem:[%s6319_s9 + $0x18] sm:$0xff]  }
 0x2a5   : > { %v2253_v11 = vadd.bf16 %v5992_v55, %v2183_v43 }
 0x2a6   : > { %v2254_v24 = vadd.bf16 %v5995_v8, %v2184_v13 }
 0x2a7   : > { %v2285_v33 = vmax.bf16 %v6334_v49, %v2253_v11 }
 0x2a8   : > { %v2098_v14 = vpop.f32.mrb[84].mxu0  ;;  %v2286_v42 = vmax.bf16 %v6334_v49, %v2254_v24 }
 0x2a9   : > { %v2100_v18 = vpop.f32.mrb[85].mxu0 }
 0x2aa   : > { %v2102_v58 = vpop.f32.mrb[86].mxu0  ;;  %2525 = vmatprep.mubr.bf16.mxu1 %v2286_v42 }
 0x2ab   : > { %v2185_v16 = vpack.c.bf16 %v2102_v58, %v2098_v14  ;;  %v2104_v46 = vpop.f32.mrb[87].mxu0  ;;  %2526 = vmatmul.mubr.bf16.gmra.mrb[112].mxu1 %v2285_v33 }
 0x2ac   : > { %v2186_v1 = vpack.c.bf16 %v2104_v46, %v2100_v18 }
 0x2ad   : > { %v2255_v50 = vadd.bf16 %v5992_v55, %v2185_v16 }
 0x2ae   : > { %v2256_v19 = vadd.bf16 %v5995_v8, %v2186_v1 }
 0x2af   : > { %v2287_v28 = vmax.bf16 %v6334_v49, %v2255_v50 }
 0x2b0   : > { %v2108_v3 = vpop.f32.mrb[88].mxu0  ;;  %v2288_v39 = vmax.bf16 %v6334_v49, %v2256_v19 }
 0x2b1   : > { %v2110_v63 = vpop.f32.mrb[89].mxu0 }
 0x2b2   : > { %v2112_v45 = vpop.f32.mrb[90].mxu0  ;;  %2533 = vmatprep.mubr.bf16.mxu1 %v2288_v39 }
 0x2b3   : > { %v2187_v7 = vpack.c.bf16 %v2112_v45, %v2108_v3  ;;  %v2114_v32 = vpop.f32.mrb[91].mxu0  ;;  %2534 = vmatmul.mubr.bf16.gmra.mrb[116].mxu1 %v2287_v28 }
 0x2b4   : > { %v2188_v25 = vpack.c.bf16 %v2114_v32, %v2110_v63  ;;  %v2606_v32 = vld [vmem:[%s6316_s6] sm:$0x1] }
 0x2b5   : > { %v2257_v10 = vadd.bf16 %v5992_v55, %v2187_v7 }
 0x2b6   : > { %v2258_v48 = vadd.bf16 %v5995_v8, %v2188_v25 }
 0x2b7   : > { %v2289_v37 = vmax.bf16 %v6334_v49, %v2257_v10  ;;  %v2608_v10 = vpack.i.b16 %v2606_v32, %v2606_v32 }
 0x2b8   : > { %v2118_v31 = vpop.f32.mrb[92].mxu0  ;;  %v2290_v41 = vmax.bf16 %v6334_v49, %v2258_v48 }
 0x2b9   : > { %v2120_v62 = vpop.f32.mrb[93].mxu0 }
 0x2ba   : > { %v2122_v34 = vpop.f32.mrb[94].mxu0  ;;  %2541 = vmatprep.mubr.bf16.mxu1 %v2290_v41 }
 0x2bb   : > { %v2189_v35 = vpack.c.bf16 %v2122_v34, %v2118_v31  ;;  %v2124_v29 = vpop.f32.mrb[95].mxu0  ;;  %2542 = vmatmul.mubr.bf16.gmra.mrb[120].mxu1 %v2289_v37 }
 0x2bc   : > { %v2190_v47 = vpack.c.bf16 %v2124_v29, %v2120_v62 }
 0x2bd   : > { %v2259_v6 = vadd.bf16 %v5992_v55, %v2189_v35 }
 0x2be   : > { %v2260_v9 = vadd.bf16 %v5995_v8, %v2190_v47 }
 0x2bf   : > { %v2291_v15 = vmax.bf16 %v6334_v49, %v2259_v6 }
 0x2c0   : > { %v2128_v38 = vpop.f32.mrb[96].mxu0  ;;  %v2292_v21 = vmax.bf16 %v6334_v49, %v2260_v9 }
 0x2c1   : > { %v2130_v17 = vpop.f32.mrb[97].mxu0 }
 0x2c2   : > { %v2132_v59 = vpop.f32.mrb[98].mxu0  ;;  %2549 = vmatprep.mubr.bf16.mxu1 %v2292_v21 }
 0x2c3   : > { %v2191_v4 = vpack.c.bf16 %v2132_v59, %v2128_v38  ;;  %v2134_v56 = vpop.f32.mrb[99].mxu0  ;;  %2550 = vmatmul.mubr.bf16.gmra.mrb[124].mxu1 %v2291_v15 }
 0x2c4   : > { %v2192_v54 = vpack.c.bf16 %v2134_v56, %v2130_v17 }
 0x2c5   : > { %v2261_v20 = vadd.bf16 %v5992_v55, %v2191_v4 }
 0x2c6   : > { %v2262_v44 = vadd.bf16 %v5995_v8, %v2192_v54 }
 0x2c7   : > { %v2293_v57 = vmax.bf16 %v6334_v49, %v2261_v20  ;;  %v4808_v20 = vld [vmem:[%s6319_s9 + $0x8] sm:$0xff]  }
 0x2c8   : > { %v2138_v60 = vpop.f32.mrb[100].mxu0  ;;  %v2294_v22 = vmax.bf16 %v6334_v49, %v2262_v44 }
 0x2c9   : > { %v2140_v40 = vpop.f32.mrb[101].mxu0 }
 0x2ca   : > { %v2142_v27 = vpop.f32.mrb[102].mxu0  ;;  %2557 = vmatprep.mubr.bf16.mxu1 %v2294_v22 }
 0x2cb   : > { %v2193_v2 = vpack.c.bf16 %v2142_v27, %v2138_v60  ;;  %v2144_v23 = vpop.f32.mrb[103].mxu0  ;;  %2558 = vmatmul.mubr.bf16.gmra.mrb[128].mxu1 %v2293_v57 }
 0x2cc   : > { %v2194_v5 = vpack.c.bf16 %v2144_v23, %v2140_v40 }
 0x2cd   : > { %v2263_v0 = vadd.bf16 %v5992_v55, %v2193_v2 }
 0x2ce   : > { %v2264_v12 = vadd.bf16 %v5995_v8, %v2194_v5 }
 0x2cf   : > { %v2295_v13 = vmax.bf16 %v6334_v49, %v2263_v0 }
 0x2d0   : > { %v2148_v51 = vpop.f32.mrb[104].mxu0  ;;  %v2296_v43 = vmax.bf16 %v6334_v49, %v2264_v12 }
 0x2d1   : > { %v2150_v61 = vpop.f32.mrb[105].mxu0 }
 0x2d2   : > { %v2152_v11 = vpop.f32.mrb[106].mxu0  ;;  %2565 = vmatprep.mubr.bf16.mxu1 %v2296_v43  ;;  %v4811_v43 = vld [vmem:[%s6319_s9 + $0x20] sm:$0xff]  }
 0x2d3   : > { %v2195_v24 = vpack.c.bf16 %v2152_v11, %v2148_v51  ;;  %v2154_v14 = vpop.f32.mrb[107].mxu0  ;;  %2566 = vmatmul.mubr.bf16.gmra.mrb[132].mxu1 %v2295_v13 }
 0x2d4   : > { %v2196_v42 = vpack.c.bf16 %v2154_v14, %v2150_v61 }
 0x2d5   : > { %v2265_v18 = vadd.bf16 %v5992_v55, %v2195_v24 }
 0x2d6   : > { %v2266_v33 = vadd.bf16 %v5995_v8, %v2196_v42 }
 0x2d7   : > { %v2297_v1 = vmax.bf16 %v6334_v49, %v2265_v18  ;;  %v4812_v18 = vld [vmem:[%s6319_s9 + $0x28] sm:$0xff]  }
 0x2d8   : > { %v2158_v58 = vpop.f32.mrb[108].mxu0  ;;  %v2298_v16 = vmax.bf16 %v6334_v49, %v2266_v33 }
 0x2d9   : > { %v2160_v46 = vpop.f32.mrb[109].mxu0 }
 0x2da   : > { %v2162_v50 = vpop.f32.mrb[110].mxu0  ;;  %2573 = vmatprep.mubr.bf16.mxu1 %v2298_v16 }
 0x2db   : > { %v2197_v19 = vpack.c.bf16 %v2162_v50, %v2158_v58  ;;  %v2164_v3 = vpop.f32.mrb[111].mxu0  ;;  %2574 = vmatmul.mubr.bf16.gmra.mrb[136].mxu1 %v2297_v1 }
 0x2dc   : > { %v2198_v39 = vpack.c.bf16 %v2164_v3, %v2160_v46 }
 0x2dd   : > { %v2267_v63 = vadd.bf16 %v5992_v55, %v2197_v19  ;;  %v6089_v55 = vrot.slane %v2608_v10, %v5337_v30 }
 0x2de   : > { %v2268_v28 = vadd.bf16 %v5995_v8, %v2198_v39  ;;  %v4807_v8 = vld [vmem:[%s6319_s9] sm:$0xff]  }
 0x2df   : > { %v2299_v7 = vmax.bf16 %v6334_v49, %v2267_v63  ;;  %4437 = vmatprep.subr.bf16.mxu1 %v4807_v8 }
 0x2e0   : > { %v2300_v45 = vmax.bf16 %v6334_v49, %v2268_v28 }
 0x2e2   : > { %2581 = vmatprep.mubr.bf16.mxu1 %v2300_v45 }
 0x2e3   : > { %2582 = vmatmul.mubr.bf16.gmra.mrb[140].mxu1 %v2299_v7 }
 0x33e   : > { %v4221_v25 = vpop.f32.mrb[80].mxu1 }
 0x33f   : > { %v4222_v48 = vpop.f32.mrb[81].mxu1 }
 0x340   : > { %v4223_v31 = vadd.f32 %v4222_v48, %v4221_v25  ;;  %v4224_v41 = vpop.f32.mrb[82].mxu1 }
 0x341   : > { %v4225_v62 = vpop.f32.mrb[83].mxu1 }
 0x342   : > { %v4226_v37 = vadd.f32 %v4225_v62, %v4224_v41 }
 0x344   : > { %v2590_v34 = vpack.c.bf16 %v4226_v37, %v4223_v31 }
 0x346   : > { %v2614_v35 = vadd.bf16 %v6089_v55, %v2590_v34  ;;  %v4227_v29 = vpop.f32.mrb[84].mxu1 }
 0x347   : > { %v4228_v47 = vpop.f32.mrb[85].mxu1 }
 0x348   : > { %v4229_v6 = vadd.f32 %v4228_v47, %v4227_v29  ;;  %v4230_v9 = vpop.f32.mrb[86].mxu1  ;;  %v2630_v38 = vmax.bf16 %v6334_v49, %v2614_v35 }
 0x349   : > { %v4231_v21 = vpop.f32.mrb[87].mxu1 }
 0x34a   : > { %v4232_v52 = vadd.f32 %v4231_v21, %v4230_v9  ;;  %4405 = vmatprep.mubr.bf16.mxu1 %v2630_v38 }
 0x34c   : > { %v2591_v17 = vpack.c.bf16 %v4232_v52, %v4229_v6 }
 0x34e   : > { %v2615_v15 = vadd.bf16 %v6089_v55, %v2591_v17  ;;  %v4233_v59 = vpop.f32.mrb[88].mxu1 }
 0x34f   : > { %v4234_v4 = vpop.f32.mrb[89].mxu1 }
 0x350   : > { %v2631_v56 = vmax.bf16 %v6334_v49, %v2615_v15  ;;  %v4235_v54 = vadd.f32 %v4234_v4, %v4233_v59  ;;  %v4236_v53 = vpop.f32.mrb[90].mxu1 }
 0x351   : > { %v4237_v44 = vpop.f32.mrb[91].mxu1 }
 0x352   : > { %v4238_v60 = vadd.f32 %v4237_v44, %v4236_v53  ;;  %4406 = vmatmul.mubr.bf16.vlgmr.msra.gmra.mrb[144].mxu1 %v2631_v56 }
 0x353   : > { %4438 = vmatpush3.bf16.msra.mxu1 %v4807_v8 }
 0x354   : > { %v2592_v22 = vpack.c.bf16 %v4238_v60, %v4235_v54  ;;  %4439 = vmatprep.subr.bf16.mxu1 %v4808_v20 }
 0x356   : > { %v2616_v40 = vadd.bf16 %v6089_v55, %v2592_v22  ;;  %v4239_v57 = vpop.f32.mrb[92].mxu1 }
 0x357   : > { %v4240_v27 = vpop.f32.mrb[93].mxu1  ;;  %4440 = vmatpush3.bf16.msra.mxu1 %v4808_v20 }
 0x358   : > { %v4241_v2 = vadd.f32 %v4240_v27, %v4239_v57  ;;  %v4242_v23 = vpop.f32.mrb[94].mxu1  ;;  %v2632_v5 = vmax.bf16 %v6334_v49, %v2616_v40  ;;  %4441 = vmatprep.subr.bf16.mxu1 %v4809_v26 }
 0x359   : > { %v4243_v0 = vpop.f32.mrb[95].mxu1 }
 0x35a   : > { %v4244_v12 = vadd.f32 %v4243_v0, %v4242_v23  ;;  %4409 = vmatprep.mubr.bf16.mxu1 %v2632_v5 }
 0x35b   : > { %4442 = vmatpush3.bf16.msra.mxu1 %v4809_v26 }
 0x35c   : > { %v2593_v51 = vpack.c.bf16 %v4244_v12, %v4241_v2  ;;  %4443 = vmatprep.subr.bf16.mxu1 %v4810_v36 }
 0x35e   : > { %v2617_v61 = vadd.bf16 %v6089_v55, %v2593_v51  ;;  %v4245_v13 = vpop.f32.mrb[96].mxu1 }
 0x35f   : > { %v4246_v11 = vpop.f32.mrb[97].mxu1  ;;  %4444 = vmatpush3.bf16.msra.mxu1 %v4810_v36 }
 0x360   : > { %v4247_v24 = vadd.f32 %v4246_v11, %v4245_v13  ;;  %v4248_v14 = vpop.f32.mrb[98].mxu1  ;;  %v2633_v42 = vmax.bf16 %v6334_v49, %v2617_v61  ;;  %4445 = vmatprep.subr.bf16.mxu1 %v4811_v43 }
 0x361   : > { %v4249_v33 = vpop.f32.mrb[99].mxu1 }
 0x362   : > { %v4250_v58 = vadd.f32 %v4249_v33, %v4248_v14  ;;  %4410 = vmatmul.mubr.bf16.gmra.mrb[148].mxu1 %v2633_v42 }
 0x363   : > { %4446 = vmatpush3.bf16.msra.mxu1 %v4811_v43 }
 0x364   : > { %v2594_v16 = vpack.c.bf16 %v4250_v58, %v4247_v24  ;;  %4447 = vmatprep.subr.bf16.mxu1 %v4812_v18 }
 0x366   : > { %v2618_v46 = vadd.bf16 %v6089_v55, %v2594_v16  ;;  %v4251_v1 = vpop.f32.mrb[100].mxu1 }
 0x367   : > { %v4252_v50 = vpop.f32.mrb[101].mxu1  ;;  %4448 = vmatpush3.bf16.msra.mxu1 %v4812_v18 }
 0x368   : > { %v4253_v19 = vadd.f32 %v4252_v50, %v4251_v1  ;;  %v4254_v3 = vpop.f32.mrb[102].mxu1  ;;  %v2634_v39 = vmax.bf16 %v6334_v49, %v2618_v46 }
 0x369   : > { %v4255_v63 = vpop.f32.mrb[103].mxu1 }
 0x36a   : > { %v4256_v28 = vadd.f32 %v4255_v63, %v4254_v3  ;;  %4413 = vmatprep.mubr.bf16.mxu1 %v2634_v39 }
 0x36c   : > { %v2595_v45 = vpack.c.bf16 %v4256_v28, %v4253_v19 }
 0x36e   : > { %v2619_v7 = vadd.bf16 %v6089_v55, %v2595_v45  ;;  %v4257_v32 = vpop.f32.mrb[104].mxu1 }
 0x36f   : > { %v4258_v25 = vpop.f32.mrb[105].mxu1 }
 0x370   : > { %v4259_v10 = vadd.f32 %v4258_v25, %v4257_v32  ;;  %v4260_v48 = vpop.f32.mrb[106].mxu1  ;;  %v2635_v31 = vmax.bf16 %v6334_v49, %v2619_v7 }
 0x371   : > { %v4261_v41 = vpop.f32.mrb[107].mxu1 }
 0x372   : > { %v4262_v62 = vadd.f32 %v4261_v41, %v4260_v48  ;;  %4414 = vmatmul.mubr.bf16.gmra.mrb[152].mxu1 %v2635_v31  ;;  %v4813_v48 = vld [vmem:[%s6319_s9 + $0x30] sm:$0xff]  }
 0x373   : > { %4449 = vmatprep.subr.bf16.mxu1 %v4813_v48 }
 0x374   : > { %v2596_v37 = vpack.c.bf16 %v4262_v62, %v4259_v10  ;;  %4450 = vmatpush3.bf16.msra.mxu1 %v4813_v48 }
 0x376   : > { %v2620_v8 = vadd.bf16 %v6089_v55, %v2596_v37  ;;  %v4263_v34 = vpop.f32.mrb[108].mxu1 }
 0x377   : > { %v4264_v35 = vpop.f32.mrb[109].mxu1 }
 0x378   : > { %v4265_v29 = vadd.f32 %v4264_v35, %v4263_v34  ;;  %v4266_v47 = vpop.f32.mrb[110].mxu1  ;;  %v2636_v6 = vmax.bf16 %v6334_v49, %v2620_v8  ;;  %v4814_v35 = vld [vmem:[%s6319_s9 + $0x38] sm:$0xff]  }
 0x379   : > { %v4267_v9 = vpop.f32.mrb[111].mxu1  ;;  %4451 = vmatprep.subr.bf16.mxu1 %v4814_v35 }
 0x37a   : > { %v4268_v38 = vadd.f32 %v4267_v9, %v4266_v47  ;;  %4417 = vmatprep.mubr.bf16.mxu1 %v2636_v6  ;;  %4452 = vmatpush3.bf16.msra.mxu1 %v4814_v35 }
 0x37c   : > { %v2597_v21 = vpack.c.bf16 %v4268_v38, %v4265_v29 }
 0x37e   : > { %v2621_v52 = vadd.bf16 %v6089_v55, %v2597_v21  ;;  %v4269_v17 = vpop.f32.mrb[112].mxu1 }
 0x37f   : > { %v4270_v15 = vpop.f32.mrb[113].mxu1 }
 0x380   : > { %v4271_v59 = vadd.f32 %v4270_v15, %v4269_v17  ;;  %v4272_v4 = vpop.f32.mrb[114].mxu1  ;;  %v2637_v56 = vmax.bf16 %v6334_v49, %v2621_v52 }
 0x381   : > { %v4273_v54 = vpop.f32.mrb[115].mxu1 }
 0x382   : > { %v4274_v53 = vadd.f32 %v4273_v54, %v4272_v4  ;;  %4418 = vmatmul.mubr.bf16.gmra.mrb[156].mxu1 %v2637_v56 }
 0x384   : > { %v2598_v20 = vpack.c.bf16 %v4274_v53, %v4271_v59 }
 0x386   : > { %v2622_v44 = vadd.bf16 %v6089_v55, %v2598_v20  ;;  %v4275_v60 = vpop.f32.mrb[116].mxu1 }
 0x387   : > { %v4276_v22 = vpop.f32.mrb[117].mxu1 }
 0x388   : > { %v4277_v26 = vadd.f32 %v4276_v22, %v4275_v60  ;;  %v4278_v40 = vpop.f32.mrb[118].mxu1  ;;  %v2638_v57 = vmax.bf16 %v6334_v49, %v2622_v44 }
 0x389   : > { %v4279_v27 = vpop.f32.mrb[119].mxu1 }
 0x38a   : > { %v4280_v2 = vadd.f32 %v4279_v27, %v4278_v40  ;;  %4421 = vmatprep.mubr.bf16.mxu1 %v2638_v57  ;;  %v2887_v27 = vld [vmem:[%s6318_s8] sm:$0x1] }
 0x38c   : > { %v2599_v23 = vpack.c.bf16 %v4280_v2, %v4277_v26  ;;  %v4815_v2 = vld [vmem:[%s6321_s11] sm:$0xff]  }
 0x38d   : > { %4485 = vmatprep.subr.bf16.mxu0 %v4815_v2 }
 0x38e   : > { %v2623_v5 = vadd.bf16 %v6089_v55, %v2599_v23  ;;  %v4281_v36 = vpop.f32.mrb[120].mxu1  ;;  %v4816_v23 = vld [vmem:[%s6321_s11 + $0x8] sm:$0xff]   ;;  %4486 = vmatpush3.bf16.msra.mxu0 %v4815_v2 }
 0x38f   : > { %v4282_v0 = vpop.f32.mrb[121].mxu1  ;;  %4487 = vmatprep.subr.bf16.mxu0 %v4816_v23 }
 0x390   : > { %v4283_v12 = vadd.f32 %v4282_v0, %v4281_v36  ;;  %v4284_v51 = vpop.f32.mrb[122].mxu1  ;;  %v2639_v43 = vmax.bf16 %v6334_v49, %v2623_v5  ;;  %v2889_v5 = vpack.i.b16 %v2887_v27, %v2887_v27 }
 0x391   : > { %v4285_v61 = vpop.f32.mrb[123].mxu1 }
 0x392   : > { %v4286_v13 = vadd.f32 %v4285_v61, %v4284_v51  ;;  %4422 = vmatmul.mubr.bf16.gmra.mrb[160].mxu1 %v2639_v43  ;;  %4488 = vmatpush3.bf16.msra.mxu0 %v4816_v23 }
 0x394   : > { %v2600_v11 = vpack.c.bf16 %v4286_v13, %v4283_v12  ;;  %v6160_v12 = vrot.slane %v2889_v5, %v5337_v30  ;;  %v4818_v13 = vld [vmem:[%s6321_s11 + $0x18] sm:$0xff]  }
 0x396   : > { %v2624_v24 = vadd.bf16 %v6089_v55, %v2600_v11  ;;  %v4287_v14 = vpop.f32.mrb[124].mxu1 }
 0x397   : > { %v4288_v42 = vpop.f32.mrb[125].mxu1 }
 0x398   : > { %v4289_v18 = vadd.f32 %v4288_v42, %v4287_v14  ;;  %v4290_v33 = vpop.f32.mrb[126].mxu1  ;;  %v2640_v58 = vmax.bf16 %v6334_v49, %v2624_v24  ;;  %v4819_v42 = vld [vmem:[%s6321_s11 + $0x20] sm:$0xff]  }
 0x399   : > { %v4291_v16 = vpop.f32.mrb[127].mxu1 }
 0x39a   : > { %v4292_v46 = vadd.f32 %v4291_v16, %v4290_v33  ;;  %4425 = vmatprep.mubr.bf16.mxu1 %v2640_v58  ;;  %v4820_v58 = vld [vmem:[%s6321_s11 + $0x28] sm:$0xff]  }
 0x39c   : > { %v2601_v1 = vpack.c.bf16 %v4292_v46, %v4289_v18 }
 0x39e   : > { %v2625_v50 = vadd.bf16 %v6089_v55, %v2601_v1  ;;  %v4293_v19 = vpop.f32.mrb[128].mxu1 }
 0x39f   : > { %v4294_v3 = vpop.f32.mrb[129].mxu1 }
 0x3a0   : > { %v4295_v39 = vadd.f32 %v4294_v3, %v4293_v19  ;;  %v4296_v63 = vpop.f32.mrb[130].mxu1  ;;  %v2641_v28 = vmax.bf16 %v6334_v49, %v2625_v50 }
 0x3a1   : > { %v4297_v45 = vpop.f32.mrb[131].mxu1 }
 0x3a2   : > { %v4298_v7 = vadd.f32 %v4297_v45, %v4296_v63  ;;  %4426 = vmatmul.mubr.bf16.gmra.mrb[164].mxu1 %v2641_v28 }
 0x3a4   : > { %v2602_v32 = vpack.c.bf16 %v4298_v7, %v4295_v39 }
 0x3a6   : > { %v2626_v25 = vadd.bf16 %v6089_v55, %v2602_v32  ;;  %v4299_v10 = vpop.f32.mrb[132].mxu1 }
 0x3a7   : > { %v4300_v31 = vpop.f32.mrb[133].mxu1 }
 0x3a8   : > { %v4301_v41 = vadd.f32 %v4300_v31, %v4299_v10  ;;  %v4302_v62 = vpop.f32.mrb[134].mxu1  ;;  %v2642_v37 = vmax.bf16 %v6334_v49, %v2626_v25 }
 0x3a9   : > { %v4303_v8 = vpop.f32.mrb[135].mxu1 }
 0x3aa   : > { %v4304_v34 = vadd.f32 %v4303_v8, %v4302_v62  ;;  %4429 = vmatprep.mubr.bf16.mxu1 %v2642_v37 }
 0x3ac   : > { %v2603_v29 = vpack.c.bf16 %v4304_v34, %v4301_v41 }
 0x3ae   : > { %v2627_v47 = vadd.bf16 %v6089_v55, %v2603_v29  ;;  %v4305_v6 = vpop.f32.mrb[136].mxu1 }
 0x3af   : > { %v4306_v9 = vpop.f32.mrb[137].mxu1 }
 0x3b0   : > { %v4307_v38 = vadd.f32 %v4306_v9, %v4305_v6  ;;  %v4308_v21 = vpop.f32.mrb[138].mxu1  ;;  %v2643_v52 = vmax.bf16 %v6334_v49, %v2627_v47 }
 0x3b1   : > { %v4309_v17 = vpop.f32.mrb[139].mxu1 }
 0x3b2   : > { %v4310_v15 = vadd.f32 %v4309_v17, %v4308_v21  ;;  %4430 = vmatmul.mubr.bf16.gmra.mrb[168].mxu1 %v2643_v52 }
 0x3b4   : > { %v2604_v59 = vpack.c.bf16 %v4310_v15, %v4307_v38 }
 0x3b6   : > { %v2628_v4 = vadd.bf16 %v6089_v55, %v2604_v59  ;;  %v4311_v56 = vpop.f32.mrb[140].mxu1 }
 0x3b7   : > { %v4312_v54 = vpop.f32.mrb[141].mxu1 }
 0x3b8   : > { %v4313_v53 = vadd.f32 %v4312_v54, %v4311_v56  ;;  %v4314_v20 = vpop.f32.mrb[142].mxu1  ;;  %v2644_v44 = vmax.bf16 %v6334_v49, %v2628_v4 }
 0x3b9   : > { %v4315_v60 = vpop.f32.mrb[143].mxu1 }
 0x3ba   : > { %v4316_v22 = vadd.f32 %v4315_v60, %v4314_v20  ;;  %4433 = vmatprep.mubr.bf16.mxu1 %v2644_v44 }
 0x3bc   : > { %v2605_v26 = vpack.c.bf16 %v4316_v22, %v4313_v53 }
 0x3be   : > { %v2629_v40 = vadd.bf16 %v6089_v55, %v2605_v26  ;;  %v4817_v55 = vld [vmem:[%s6321_s11 + $0x10] sm:$0xff]  }
 0x3bf   : > { %4489 = vmatprep.subr.bf16.mxu0 %v4817_v55 }
 0x3c0   : > { %v2645_v57 = vmax.bf16 %v6334_v49, %v2629_v40  ;;  %4490 = vmatpush3.bf16.msra.mxu0 %v4817_v55 }
 0x3c1   : > { %4491 = vmatprep.subr.bf16.mxu0 %v4818_v13 }
 0x3c2   : > { %4434 = vmatmul.mubr.bf16.gmra.mrb[172].mxu1 %v2645_v57 }
 0x3c4   : > { %4492 = vmatpush3.bf16.msra.mxu0 %v4818_v13 }
 0x3c5   : > { %4493 = vmatprep.subr.bf16.mxu0 %v4819_v42 }
 0x3c8   : > { %4494 = vmatpush3.bf16.msra.mxu0 %v4819_v42 }
 0x3c9   : > { %4495 = vmatprep.subr.bf16.mxu0 %v4820_v58 }
 0x3cc   : > { %4496 = vmatpush3.bf16.msra.mxu0 %v4820_v58 }
 0x425   : > { %v4407_v36 = vpop.f32.mrb[144].mxu1 }
 0x426   : > { %v2744_v0 = vpop.f32.mrb[145].mxu1 }
 0x427   : > { %v4408_v51 = vpop.f32.mrb[146].mxu1 }
 0x428   : > { %v2872_v43 = vpack.c.bf16 %v4408_v51, %v4407_v36  ;;  %v2747_v61 = vpop.f32.mrb[147].mxu1  ;;  %v4821_v51 = vld [vmem:[%s6321_s11 + $0x30] sm:$0xff]  }
 0x429   : > { %v2871_v11 = vpack.c.bf16 %v2747_v61, %v2744_v0  ;;  %4497 = vmatprep.subr.bf16.mxu0 %v4821_v51 }
 0x42a   : > { %v2896_v24 = vadd.bf16 %v6160_v12, %v2872_v43  ;;  %4498 = vmatpush3.bf16.msra.mxu0 %v4821_v51 }
 0x42b   : > { %v2895_v14 = vadd.bf16 %v6160_v12, %v2871_v11 }
 0x42c   : > { %v2912_v33 = vmax.bf16 %v6334_v49, %v2896_v24 }
 0x42d   : > { %v2911_v18 = vmax.bf16 %v6334_v49, %v2895_v14  ;;  %v4822_v14 = vld [vmem:[%s6321_s11 + $0x38] sm:$0xff]  }
 0x42e   : > { %4499 = vmatprep.subr.bf16.mxu0 %v4822_v14 }
 0x42f   : > { %4453 = vmatprep.mubr.bf16.mxu1 %v2911_v18  ;;  %4500 = vmatpush3.bf16.msra.mxu0 %v4822_v14 }
 0x430   : > { %4454 = vmatmul.mubr.bf16.vlgmr.msra.gmra.mrb[176].mxu1 %v2912_v33 }
 0x435   : > { %v4411_v16 = vpop.f32.mrb[148].mxu1 }
 0x436   : > { %v2760_v46 = vpop.f32.mrb[149].mxu1 }
 0x437   : > { %v4412_v1 = vpop.f32.mrb[150].mxu1 }
 0x438   : > { %v2874_v50 = vpack.c.bf16 %v4412_v1, %v4411_v16  ;;  %v2763_v19 = vpop.f32.mrb[151].mxu1 }
 0x439   : > { %v2873_v3 = vpack.c.bf16 %v2763_v19, %v2760_v46 }
 0x43a   : > { %v2898_v39 = vadd.bf16 %v6160_v12, %v2874_v50 }
 0x43b   : > { %v2897_v63 = vadd.bf16 %v6160_v12, %v2873_v3 }
 0x43c   : > { %v2914_v45 = vmax.bf16 %v6334_v49, %v2898_v39 }
 0x43d   : > { %v2913_v28 = vmax.bf16 %v6334_v49, %v2897_v63 }
 0x43f   : > { %4457 = vmatprep.mubr.bf16.mxu1 %v2913_v28 }
 0x440   : > { %4458 = vmatmul.mubr.bf16.gmra.mrb[180].mxu1 %v2914_v45 }
 0x445   : > { %v4415_v7 = vpop.f32.mrb[152].mxu1 }
 0x446   : > { %v2776_v32 = vpop.f32.mrb[153].mxu1 }
 0x447   : > { %v4416_v25 = vpop.f32.mrb[154].mxu1 }
 0x448   : > { %v2876_v10 = vpack.c.bf16 %v4416_v25, %v4415_v7  ;;  %v2779_v48 = vpop.f32.mrb[155].mxu1 }
 0x449   : > { %v2875_v31 = vpack.c.bf16 %v2779_v48, %v2776_v32  ;;  %v3168_v32 = vld [vmem:[%s6320_s10] sm:$0x1] }
 0x44a   : > { %v2900_v41 = vadd.bf16 %v6160_v12, %v2876_v10  ;;  %v3170_v25 = vpack.i.b16 %v3168_v32, %v3168_v32 }
 0x44b   : > { %v2899_v62 = vadd.bf16 %v6160_v12, %v2875_v31 }
 0x44c   : > { %v2916_v8 = vmax.bf16 %v6334_v49, %v2900_v41  ;;  %v6213_v31 = vrot.slane %v3170_v25, %v5337_v30 }
 0x44d   : > { %v2915_v37 = vmax.bf16 %v6334_v49, %v2899_v62 }
 0x44f   : > { %4461 = vmatprep.mubr.bf16.mxu1 %v2915_v37 }
 0x450   : > { %4462 = vmatmul.mubr.bf16.gmra.mrb[184].mxu1 %v2916_v8 }
 0x455   : > { %v4419_v34 = vpop.f32.mrb[156].mxu1 }
 0x456   : > { %v2792_v35 = vpop.f32.mrb[157].mxu1 }
 0x457   : > { %v4420_v29 = vpop.f32.mrb[158].mxu1 }
 0x458   : > { %v2878_v47 = vpack.c.bf16 %v4420_v29, %v4419_v34  ;;  %v2795_v6 = vpop.f32.mrb[159].mxu1 }
 0x459   : > { %v2877_v9 = vpack.c.bf16 %v2795_v6, %v2792_v35 }
 0x45a   : > { %v2902_v38 = vadd.bf16 %v6160_v12, %v2878_v47 }
 0x45b   : > { %v2901_v21 = vadd.bf16 %v6160_v12, %v2877_v9 }
 0x45c   : > { %v2918_v17 = vmax.bf16 %v6334_v49, %v2902_v38 }
 0x45d   : > { %v2917_v52 = vmax.bf16 %v6334_v49, %v2901_v21 }
 0x45f   : > { %4465 = vmatprep.mubr.bf16.mxu1 %v2917_v52 }
 0x460   : > { %4466 = vmatmul.mubr.bf16.gmra.mrb[188].mxu1 %v2918_v17 }
 0x465   : > { %v4423_v15 = vpop.f32.mrb[160].mxu1 }
 0x466   : > { %v2808_v59 = vpop.f32.mrb[161].mxu1 }
 0x467   : > { %v4424_v4 = vpop.f32.mrb[162].mxu1 }
 0x468   : > { %v2880_v56 = vpack.c.bf16 %v4424_v4, %v4423_v15  ;;  %v2811_v54 = vpop.f32.mrb[163].mxu1 }
 0x469   : > { %v2879_v53 = vpack.c.bf16 %v2811_v54, %v2808_v59 }
 0x46a   : > { %v2904_v20 = vadd.bf16 %v6160_v12, %v2880_v56 }
 0x46b   : > { %v2903_v44 = vadd.bf16 %v6160_v12, %v2879_v53 }
 0x46c   : > { %v2920_v22 = vmax.bf16 %v6334_v49, %v2904_v20 }
 0x46d   : > { %v2919_v60 = vmax.bf16 %v6334_v49, %v2903_v44 }
 0x46f   : > { %4469 = vmatprep.mubr.bf16.mxu1 %v2919_v60 }
 0x470   : > { %4470 = vmatmul.mubr.bf16.gmra.mrb[192].mxu1 %v2920_v22 }
 0x475   : > { %v4427_v26 = vpop.f32.mrb[164].mxu1 }
 0x476   : > { %v2824_v40 = vpop.f32.mrb[165].mxu1 }
 0x477   : > { %v4428_v57 = vpop.f32.mrb[166].mxu1 }
 0x478   : > { %v2882_v27 = vpack.c.bf16 %v4428_v57, %v4427_v26  ;;  %v2827_v2 = vpop.f32.mrb[167].mxu1 }
 0x479   : > { %v2881_v23 = vpack.c.bf16 %v2827_v2, %v2824_v40 }
 0x47a   : > { %v2906_v5 = vadd.bf16 %v6160_v12, %v2882_v27 }
 0x47b   : > { %v2905_v55 = vadd.bf16 %v6160_v12, %v2881_v23 }
 0x47c   : > { %v2922_v0 = vmax.bf16 %v6334_v49, %v2906_v5 }
 0x47d   : > { %v2921_v36 = vmax.bf16 %v6334_v49, %v2905_v55 }
 0x47f   : > { %4473 = vmatprep.mubr.bf16.mxu1 %v2921_v36 }
 0x480   : > { %4474 = vmatmul.mubr.bf16.gmra.mrb[196].mxu1 %v2922_v0 }
 0x485   : > { %v4431_v43 = vpop.f32.mrb[168].mxu1 }
 0x486   : > { %v2840_v61 = vpop.f32.mrb[169].mxu1 }
 0x487   : > { %v4432_v13 = vpop.f32.mrb[170].mxu1 }
 0x488   : > { %v2884_v11 = vpack.c.bf16 %v4432_v13, %v4431_v43  ;;  %v2843_v24 = vpop.f32.mrb[171].mxu1 }
 0x489   : > { %v2883_v42 = vpack.c.bf16 %v2843_v24, %v2840_v61 }
 0x48a   : > { %v2908_v18 = vadd.bf16 %v6160_v12, %v2884_v11 }
 0x48b   : > { %v2907_v33 = vadd.bf16 %v6160_v12, %v2883_v42 }
 0x48c   : > { %v2924_v16 = vmax.bf16 %v6334_v49, %v2908_v18 }
 0x48d   : > { %v2923_v58 = vmax.bf16 %v6334_v49, %v2907_v33 }
 0x48f   : > { %4477 = vmatprep.mubr.bf16.mxu1 %v2923_v58 }
 0x490   : > { %4478 = vmatmul.mubr.bf16.gmra.mrb[200].mxu1 %v2924_v16 }
 0x495   : > { %v4435_v46 = vpop.f32.mrb[172].mxu1 }
 0x496   : > { %v2856_v1 = vpop.f32.mrb[173].mxu1 }
 0x497   : > { %v4436_v50 = vpop.f32.mrb[174].mxu1 }
 0x498   : > { %v2886_v19 = vpack.c.bf16 %v4436_v50, %v4435_v46  ;;  %v2859_v3 = vpop.f32.mrb[175].mxu1 }
 0x499   : > { %v2885_v39 = vpack.c.bf16 %v2859_v3, %v2856_v1 }
 0x49a   : > { %v2910_v63 = vadd.bf16 %v6160_v12, %v2886_v19 }
 0x49b   : > { %v2909_v28 = vadd.bf16 %v6160_v12, %v2885_v39 }
 0x49c   : > { %v2926_v7 = vmax.bf16 %v6334_v49, %v2910_v63 }
 0x49d   : > { %v2925_v45 = vmax.bf16 %v6334_v49, %v2909_v28 }
 0x49f   : > { %4481 = vmatprep.mubr.bf16.mxu1 %v2925_v45 }
 0x4a0   : > { %4482 = vmatmul.mubr.bf16.gmra.mrb[204].mxu1 %v2926_v7 }
 0x503   : > { %v4455_v10 = vpop.f32.mrb[176].mxu1 }
 0x504   : > { %v3025_v48 = vpop.f32.mrb[177].mxu1 }
 0x505   : > { %v4456_v41 = vpop.f32.mrb[178].mxu1 }
 0x506   : > { %v3153_v62 = vpack.c.bf16 %v4456_v41, %v4455_v10  ;;  %v3028_v37 = vpop.f32.mrb[179].mxu1 }
 0x507   : > { %v3152_v12 = vpack.c.bf16 %v3028_v37, %v3025_v48 }
 0x508   : > { %v3177_v8 = vadd.bf16 %v6213_v31, %v3153_v62 }
 0x509   : > { %v3176_v34 = vadd.bf16 %v6213_v31, %v3152_v12 }
 0x50a   : > { %v3193_v29 = vmax.bf16 %v6334_v49, %v3177_v8 }
 0x50b   : > { %v3192_v35 = vmax.bf16 %v6334_v49, %v3176_v34 }
 0x50d   : > { %4501 = vmatprep.mubr.bf16.mxu0 %v3192_v35 }
 0x50e   : > { %4502 = vmatmul.mubr.bf16.vlgmr.msra.gmra.mrb[112].mxu0 %v3193_v29 }
 0x513   : > { %v4459_v47 = vpop.f32.mrb[180].mxu1 }
 0x514   : > { %v3041_v6 = vpop.f32.mrb[181].mxu1 }
 0x515   : > { %v4460_v9 = vpop.f32.mrb[182].mxu1 }
 0x516   : > { %v3155_v38 = vpack.c.bf16 %v4460_v9, %v4459_v47  ;;  %v3044_v30 = vpop.f32.mrb[183].mxu1 }
 0x517   : > { %v3154_v21 = vpack.c.bf16 %v3044_v30, %v3041_v6 }
 0x518   : > { %v3179_v52 = vadd.bf16 %v6213_v31, %v3155_v38 }
 0x519   : > { %v3178_v17 = vadd.bf16 %v6213_v31, %v3154_v21 }
 0x51a   : > { %v3195_v59 = vmax.bf16 %v6334_v49, %v3179_v52 }
 0x51b   : > { %v3194_v15 = vmax.bf16 %v6334_v49, %v3178_v17 }
 0x51d   : > { %4505 = vmatprep.mubr.bf16.mxu0 %v3194_v15  ;;  %v6250_v15 = vld [vmem:[%s6322_s12] ss:$0 sm:$0xff] }
 0x51e   : > { %4506 = vmatmul.mubr.bf16.gmra.mrb[116].mxu0 %v3195_v59 }
 0x523   : > { %v4463_v4 = vpop.f32.mrb[184].mxu1 }
 0x524   : > { %v3057_v56 = vpop.f32.mrb[185].mxu1 }
 0x525   : > { %v4464_v54 = vpop.f32.mrb[186].mxu1 }
 0x526   : > { %v3157_v53 = vpack.c.bf16 %v4464_v54, %v4463_v4  ;;  %v3060_v20 = vpop.f32.mrb[187].mxu1 }
 0x527   : > { %v3156_v44 = vpack.c.bf16 %v3060_v20, %v3057_v56 }
 0x528   : > { %v3181_v60 = vadd.bf16 %v6213_v31, %v3157_v53 }
 0x529   : > { %v3180_v22 = vadd.bf16 %v6213_v31, %v3156_v44 }
 0x52a   : > { %v3197_v40 = vmax.bf16 %v6334_v49, %v3181_v60 }
 0x52b   : > { %v3196_v26 = vmax.bf16 %v6334_v49, %v3180_v22 }
 0x52d   : > { %4509 = vmatprep.mubr.bf16.mxu0 %v3196_v26 }
 0x52e   : > { %4510 = vmatmul.mubr.bf16.gmra.mrb[120].mxu0 %v3197_v40 }
 0x533   : > { %v4467_v57 = vpop.f32.mrb[188].mxu1 }
 0x534   : > { %v3073_v27 = vpop.f32.mrb[189].mxu1 }
 0x535   : > { %v4468_v2 = vpop.f32.mrb[190].mxu1 }
 0x536   : > { %v3159_v23 = vpack.c.bf16 %v4468_v2, %v4467_v57  ;;  %v3076_v5 = vpop.f32.mrb[191].mxu1 }
 0x537   : > { %v3158_v55 = vpack.c.bf16 %v3076_v5, %v3073_v27 }
 0x538   : > { %v3183_v36 = vadd.bf16 %v6213_v31, %v3159_v23 }
 0x539   : > { %v3182_v0 = vadd.bf16 %v6213_v31, %v3158_v55 }
 0x53a   : > { %v3199_v43 = vmax.bf16 %v6334_v49, %v3183_v36 }
 0x53b   : > { %v3198_v51 = vmax.bf16 %v6334_v49, %v3182_v0 }
 0x53d   : > { %4513 = vmatprep.mubr.bf16.mxu0 %v3198_v51 }
 0x53e   : > { %4514 = vmatmul.mubr.bf16.gmra.mrb[124].mxu0 %v3199_v43 }
 0x543   : > { %v4471_v61 = vpop.f32.mrb[192].mxu1 }
 0x544   : > { %v3089_v13 = vpop.f32.mrb[193].mxu1 }
 0x545   : > { %v4472_v11 = vpop.f32.mrb[194].mxu1 }
 0x546   : > { %v3161_v24 = vpack.c.bf16 %v4472_v11, %v4471_v61  ;;  %v3092_v14 = vpop.f32.mrb[195].mxu1 }
 0x547   : > { %v3160_v42 = vpack.c.bf16 %v3092_v14, %v3089_v13 }
 0x548   : > { %v3185_v18 = vadd.bf16 %v6213_v31, %v3161_v24 }
 0x549   : > { %v3184_v33 = vadd.bf16 %v6213_v31, %v3160_v42 }
 0x54a   : > { %v3201_v16 = vmax.bf16 %v6334_v49, %v3185_v18 }
 0x54b   : > { %v3200_v58 = vmax.bf16 %v6334_v49, %v3184_v33 }
 0x54d   : > { %4517 = vmatprep.mubr.bf16.mxu0 %v3200_v58 }
 0x54e   : > { %4518 = vmatmul.mubr.bf16.gmra.mrb[128].mxu0 %v3201_v16 }
 0x553   : > { %v4475_v46 = vpop.f32.mrb[196].mxu1 }
 0x554   : > { %v3105_v1 = vpop.f32.mrb[197].mxu1 }
 0x555   : > { %v4476_v50 = vpop.f32.mrb[198].mxu1 }
 0x556   : > { %v3163_v19 = vpack.c.bf16 %v4476_v50, %v4475_v46  ;;  %v3108_v3 = vpop.f32.mrb[199].mxu1 }
 0x557   : > { %v3162_v39 = vpack.c.bf16 %v3108_v3, %v3105_v1 }
 0x558   : > { %v3187_v63 = vadd.bf16 %v6213_v31, %v3163_v19 }
 0x559   : > { %v3186_v28 = vadd.bf16 %v6213_v31, %v3162_v39 }
 0x55a   : > { %v3203_v7 = vmax.bf16 %v6334_v49, %v3187_v63 }
 0x55b   : > { %v3202_v45 = vmax.bf16 %v6334_v49, %v3186_v28 }
 0x55d   : > { %4521 = vmatprep.mubr.bf16.mxu0 %v3202_v45 }
 0x55e   : > { %4522 = vmatmul.mubr.bf16.gmra.mrb[132].mxu0 %v3203_v7 }
 0x563   : > { %v4479_v32 = vpop.f32.mrb[200].mxu1 }
 0x564   : > { %v3121_v25 = vpop.f32.mrb[201].mxu1 }
 0x565   : > { %v4480_v10 = vpop.f32.mrb[202].mxu1 }
 0x566   : > { %v3165_v48 = vpack.c.bf16 %v4480_v10, %v4479_v32  ;;  %v3124_v41 = vpop.f32.mrb[203].mxu1 }
 0x567   : > { %v3164_v62 = vpack.c.bf16 %v3124_v41, %v3121_v25 }
 0x568   : > { %v3189_v37 = vadd.bf16 %v6213_v31, %v3165_v48 }
 0x569   : > { %v3188_v12 = vadd.bf16 %v6213_v31, %v3164_v62 }
 0x56a   : > { %v3205_v34 = vmax.bf16 %v6334_v49, %v3189_v37 }
 0x56b   : > { %v3204_v8 = vmax.bf16 %v6334_v49, %v3188_v12 }
 0x56d   : > { %4525 = vmatprep.mubr.bf16.mxu0 %v3204_v8 }
 0x56e   : > { %4526 = vmatmul.mubr.bf16.gmra.mrb[136].mxu0 %v3205_v34 }
 0x573   : > { %v4483_v35 = vpop.f32.mrb[204].mxu1 }
 0x574   : > { %v3137_v29 = vpop.f32.mrb[205].mxu1 }
 0x575   : > { %v4484_v47 = vpop.f32.mrb[206].mxu1 }
 0x576   : > { %v3167_v6 = vpack.c.bf16 %v4484_v47, %v4483_v35  ;;  %v3140_v9 = vpop.f32.mrb[207].mxu1 }
 0x577   : > { %v3166_v38 = vpack.c.bf16 %v3140_v9, %v3137_v29 }
 0x578   : > { %v3191_v30 = vadd.bf16 %v6213_v31, %v3167_v6 }
 0x579   : > { %v3190_v21 = vadd.bf16 %v6213_v31, %v3166_v38 }
 0x57a   : > { %v3207_v17 = vmax.bf16 %v6334_v49, %v3191_v30 }
 0x57b   : > { %v3206_v52 = vmax.bf16 %v6334_v49, %v3190_v21 }
 0x57d   : > { %4529 = vmatprep.mubr.bf16.mxu0 %v3206_v52 }
 0x57e   : > { %4530 = vmatmul.mubr.bf16.gmra.mrb[140].mxu0 %v3207_v17 }
 0x5e1   : > { %v4503_v59 = vpop.f32.mrb[112].mxu0 }
 0x5e2   : > { %v3322_v4 = vadd.f32 %v4503_v59, %v6250_v15  ;;  %v3313_v56 = vpop.f32.mrb[113].mxu0 }
 0x5e3   : > { %v3314_v54 = vadd.f32 %v6250_v15, %v3313_v56  ;;  %v4504_v53 = vpop.f32.mrb[114].mxu0 }
 0x5e4   : > { %v4014_v20 = vmul.f32 -1.442695, %v3322_v4  ;;  %v3325_v31 = vadd.f32 %v4504_v53, %v6250_v15  ;;  %v3316_v44 = vpop.f32.mrb[115].mxu0 }
 0x5e5   : > { %v4012_v60 = vmul.f32 -1.442695, %v3314_v54  ;;  %v3317_v49 = vadd.f32 %v6250_v15, %v3316_v44 }
 0x5e6   : > { %4823 = vpow2.f32 %v4014_v20  ;;  %v4015_v22 = vmul.f32 -1.442695, %v3325_v31 }
 0x5e7   : > { %4825 = vpow2.f32 %v4012_v60  ;;  %v4013_v26 = vmul.f32 -1.442695, %v3317_v49 }
 0x5e8   : > { %4827 = vpow2.f32 %v4015_v22 }
 0x5e9   : > { %4829 = vpow2.f32 %v4013_v26 }
 0x5f0   : > { %v4824_v40 = vpop.eup %4823 }
 0x5f1   : > { %v4826_v57 = vpop.eup %4825  ;;  %v3538_v27 = vadd.f32 1.0, %v4824_v40  ;;  %v4507_v2 = vpop.f32.mrb[116].mxu0 }
 0x5f2   : > { %v4828_v23 = vpop.eup %4827  ;;  %v3536_v5 = vadd.f32 1.0, %v4826_v57  ;;  %v3338_v55 = vadd.f32 %v4507_v2, %v6250_v15  ;;  %v3329_v36 = vpop.f32.mrb[117].mxu0 }
 0x5f3   : > { %v4830_v0 = vpop.eup %4829  ;;  %4831 = vrcp.f32 %v3538_v27  ;;  %v3539_v51 = vadd.f32 1.0, %v4828_v23  ;;  %v3330_v43 = vadd.f32 %v6250_v15, %v3329_v36  ;;  %v4508_v61 = vpop.f32.mrb[118].mxu0 }
 0x5f4   : > { %4833 = vrcp.f32 %v3536_v5  ;;  %v3537_v13 = vadd.f32 1.0, %v4830_v0  ;;  %v4018_v11 = vmul.f32 -1.442695, %v3338_v55  ;;  %v3341_v24 = vadd.f32 %v4508_v61, %v6250_v15  ;;  %v3332_v14 = vpop.f32.mrb[119].mxu0 }
 0x5f5   : > { %4835 = vrcp.f32 %v3539_v51  ;;  %v4016_v42 = vmul.f32 -1.442695, %v3330_v43  ;;  %v3333_v18 = vadd.f32 %v6250_v15, %v3332_v14 }
 0x5f6   : > { %4837 = vrcp.f32 %v3537_v13  ;;  %v4019_v33 = vmul.f32 -1.442695, %v3341_v24 }
 0x5f7   : > { %4839 = vpow2.f32 %v4018_v11  ;;  %v4017_v58 = vmul.f32 -1.442695, %v3333_v18 }
 0x5f8   : > { %4841 = vpow2.f32 %v4016_v42 }
 0x5f9   : > { %4843 = vpow2.f32 %v4019_v33 }
 0x5fa   : > { %4845 = vpow2.f32 %v4017_v58 }
 0x5fd   : > { %v4832_v16 = vpop.eup %4831 }
 0x5fe   : > { %v4834_v46 = vpop.eup %4833 }
 0x5ff   : > { %v4836_v1 = vpop.eup %4835 }
 0x600   : > { %v4838_v50 = vpop.eup %4837  ;;  %v4118_v19 = vpack.c.bf16 %v4836_v1, %v4832_v16 }
 0x601   : > { %v4840_v3 = vpop.eup %4839  ;;  %v4113_v39 = vpack.c.bf16 %v4838_v50, %v4834_v46  ;;  %v4511_v63 = vpop.f32.mrb[120].mxu0 }
 0x602   : > { %v4842_v28 = vpop.eup %4841  ;;  %4190 = vst [vmem:[%s6265_s14 + $0x8] sm:$0xff] %v4118_v19   ;;  %v3542_v45 = vadd.f32 1.0, %v4840_v3  ;;  %v3354_v7 = vadd.f32 %v4511_v63, %v6250_v15  ;;  %v3345_v32 = vpop.f32.mrb[121].mxu0 }
 0x603   : > { %v4844_v25 = vpop.eup %4843  ;;  %4114 = vst [vmem:[%s6265_s14] sm:$0xff] %v4113_v39   ;;  %v3540_v10 = vadd.f32 1.0, %v4842_v28  ;;  %v3346_v48 = vadd.f32 %v6250_v15, %v3345_v32  ;;  %v4512_v41 = vpop.f32.mrb[122].mxu0 }
 0x604   : > { %v4846_v62 = vpop.eup %4845  ;;  %4847 = vrcp.f32 %v3542_v45  ;;  %v3543_v37 = vadd.f32 1.0, %v4844_v25  ;;  %v4022_v12 = vmul.f32 -1.442695, %v3354_v7  ;;  %v3357_v8 = vadd.f32 %v4512_v41, %v6250_v15  ;;  %v3348_v34 = vpop.f32.mrb[123].mxu0 }
 0x605   : > { %4849 = vrcp.f32 %v3540_v10  ;;  %v3541_v35 = vadd.f32 1.0, %v4846_v62  ;;  %v4020_v29 = vmul.f32 -1.442695, %v3346_v48  ;;  %v3349_v47 = vadd.f32 %v6250_v15, %v3348_v34 }
 0x606   : > { %4851 = vrcp.f32 %v3543_v37  ;;  %v4023_v6 = vmul.f32 -1.442695, %v3357_v8 }
 0x607   : > { %4853 = vrcp.f32 %v3541_v35  ;;  %v4021_v9 = vmul.f32 -1.442695, %v3349_v47 }
 0x608   : > { %4855 = vpow2.f32 %v4022_v12 }
 0x609   : > { %4857 = vpow2.f32 %v4020_v29 }
 0x60a   : > { %4859 = vpow2.f32 %v4023_v6 }
 0x60b   : > { %4861 = vpow2.f32 %v4021_v9 }
 0x60e   : > { %v4848_v38 = vpop.eup %4847 }
 0x60f   : > { %v4850_v30 = vpop.eup %4849 }
 0x610   : > { %v4852_v21 = vpop.eup %4851 }
 0x611   : > { %v4854_v52 = vpop.eup %4853  ;;  %v4128_v17 = vpack.c.bf16 %v4852_v21, %v4848_v38  ;;  %v4515_v59 = vpop.f32.mrb[124].mxu0 }
 0x612   : > { %v4856_v4 = vpop.eup %4855  ;;  %v4123_v56 = vpack.c.bf16 %v4854_v52, %v4850_v30  ;;  %v3370_v54 = vadd.f32 %v4515_v59, %v6250_v15  ;;  %v3361_v53 = vpop.f32.mrb[125].mxu0 }
 0x613   : > { %v4858_v20 = vpop.eup %4857  ;;  %4192 = vst [vmem:[%s6265_s14 + $0x18] sm:$0xff] %v4128_v17   ;;  %v3546_v31 = vadd.f32 1.0, %v4856_v4  ;;  %v3362_v44 = vadd.f32 %v6250_v15, %v3361_v53  ;;  %v4516_v60 = vpop.f32.mrb[126].mxu0 }
 0x614   : > { %v4860_v49 = vpop.eup %4859  ;;  %4191 = vst [vmem:[%s6265_s14 + $0x10] sm:$0xff] %v4123_v56   ;;  %v3544_v22 = vadd.f32 1.0, %v4858_v20  ;;  %v3373_v26 = vadd.f32 %v4516_v60, %v6250_v15  ;;  %v3364_v40 = vpop.f32.mrb[127].mxu0  ;;  %v4026_v2 = vmul.f32 -1.442695, %v3370_v54 }
 0x615   : > { %v4862_v57 = vpop.eup %4861  ;;  %4863 = vrcp.f32 %v3546_v31  ;;  %v3547_v27 = vadd.f32 1.0, %v4860_v49  ;;  %v3365_v23 = vadd.f32 %v6250_v15, %v3364_v40  ;;  %v4024_v55 = vmul.f32 -1.442695, %v3362_v44 }
 0x616   : > { %4865 = vrcp.f32 %v3544_v22  ;;  %v3545_v5 = vadd.f32 1.0, %v4862_v57  ;;  %v4027_v36 = vmul.f32 -1.442695, %v3373_v26 }
 0x617   : > { %4867 = vrcp.f32 %v3547_v27  ;;  %v4025_v0 = vmul.f32 -1.442695, %v3365_v23 }
 0x618   : > { %4869 = vrcp.f32 %v3545_v5 }
 0x619   : > { %4871 = vpow2.f32 %v4026_v2 }
 0x61a   : > { %4873 = vpow2.f32 %v4024_v55 }
 0x61b   : > { %4875 = vpow2.f32 %v4027_v36 }
 0x61c   : > { %4877 = vpow2.f32 %v4025_v0 }
 0x61f   : > { %v4864_v51 = vpop.eup %4863 }
 0x620   : > { %v4866_v43 = vpop.eup %4865 }
 0x621   : > { %v4868_v61 = vpop.eup %4867  ;;  %v4519_v13 = vpop.f32.mrb[128].mxu0 }
 0x622   : > { %v4870_v11 = vpop.eup %4869  ;;  %v4138_v24 = vpack.c.bf16 %v4868_v61, %v4864_v51  ;;  %v3386_v14 = vadd.f32 %v4519_v13, %v6250_v15  ;;  %v3377_v42 = vpop.f32.mrb[129].mxu0 }
 0x623   : > { %v4872_v18 = vpop.eup %4871  ;;  %v4133_v33 = vpack.c.bf16 %v4870_v11, %v4866_v43  ;;  %v3378_v58 = vadd.f32 %v6250_v15, %v3377_v42  ;;  %v4520_v16 = vpop.f32.mrb[130].mxu0 }
 0x624   : > { %v4874_v46 = vpop.eup %4873  ;;  %4194 = vst [vmem:[%s6265_s14 + $0x28] sm:$0xff] %v4138_v24   ;;  %v3550_v1 = vadd.f32 1.0, %v4872_v18  ;;  %v3389_v50 = vadd.f32 %v4520_v16, %v6250_v15  ;;  %v3380_v19 = vpop.f32.mrb[131].mxu0  ;;  %v4030_v7 = vmul.f32 -1.442695, %v3386_v14 }
 0x625   : > { %v4876_v3 = vpop.eup %4875  ;;  %4193 = vst [vmem:[%s6265_s14 + $0x20] sm:$0xff] %v4133_v33   ;;  %v3548_v39 = vadd.f32 1.0, %v4874_v46  ;;  %v3381_v63 = vadd.f32 %v6250_v15, %v3380_v19  ;;  %v4028_v25 = vmul.f32 -1.442695, %v3378_v58 }
 0x626   : > { %v4878_v28 = vpop.eup %4877  ;;  %4879 = vrcp.f32 %v3550_v1  ;;  %v3551_v45 = vadd.f32 1.0, %v4876_v3  ;;  %v4031_v10 = vmul.f32 -1.442695, %v3389_v50 }
 0x627   : > { %4881 = vrcp.f32 %v3548_v39  ;;  %v3549_v32 = vadd.f32 1.0, %v4878_v28  ;;  %v4029_v48 = vmul.f32 -1.442695, %v3381_v63 }
 0x628   : > { %4883 = vrcp.f32 %v3551_v45 }
 0x629   : > { %4885 = vrcp.f32 %v3549_v32 }
 0x62a   : > { %4887 = vpow2.f32 %v4030_v7 }
 0x62b   : > { %4889 = vpow2.f32 %v4028_v25 }
 0x62c   : > { %4891 = vpow2.f32 %v4031_v10 }
 0x62d   : > { %4893 = vpow2.f32 %v4029_v48 }
 0x630   : > { %v4880_v41 = vpop.eup %4879 }
 0x631   : > { %v4882_v62 = vpop.eup %4881  ;;  %v4523_v37 = vpop.f32.mrb[132].mxu0 }
 0x632   : > { %v4884_v12 = vpop.eup %4883  ;;  %v3402_v8 = vadd.f32 %v4523_v37, %v6250_v15  ;;  %v3393_v34 = vpop.f32.mrb[133].mxu0 }
 0x633   : > { %v4886_v35 = vpop.eup %4885  ;;  %v4148_v29 = vpack.c.bf16 %v4884_v12, %v4880_v41  ;;  %v3394_v47 = vadd.f32 %v6250_v15, %v3393_v34  ;;  %v4524_v6 = vpop.f32.mrb[134].mxu0 }
 0x634   : > { %v4888_v9 = vpop.eup %4887  ;;  %v4143_v38 = vpack.c.bf16 %v4886_v35, %v4882_v62  ;;  %v4034_v30 = vmul.f32 -1.442695, %v3402_v8  ;;  %v3405_v21 = vadd.f32 %v4524_v6, %v6250_v15  ;;  %v3396_v52 = vpop.f32.mrb[135].mxu0 }
 0x635   : > { %v4890_v17 = vpop.eup %4889  ;;  %4196 = vst [vmem:[%s6265_s14 + $0x38] sm:$0xff] %v4148_v29   ;;  %v3554_v59 = vadd.f32 1.0, %v4888_v9  ;;  %v3397_v4 = vadd.f32 %v6250_v15, %v3396_v52  ;;  %v4032_v31 = vmul.f32 -1.442695, %v3394_v47 }
 0x636   : > { %v4892_v56 = vpop.eup %4891  ;;  %4195 = vst [vmem:[%s6265_s14 + $0x30] sm:$0xff] %v4143_v38   ;;  %v3552_v54 = vadd.f32 1.0, %v4890_v17  ;;  %4895 = vpow2.f32 %v4034_v30  ;;  %v4035_v60 = vmul.f32 -1.442695, %v3405_v21 }
 0x637   : > { %v4894_v53 = vpop.eup %4893  ;;  %4897 = vrcp.f32 %v3554_v59  ;;  %v3555_v20 = vadd.f32 1.0, %v4892_v56  ;;  %v4033_v49 = vmul.f32 -1.442695, %v3397_v4 }
 0x638   : > { %4899 = vrcp.f32 %v3552_v54  ;;  %v3553_v44 = vadd.f32 1.0, %v4894_v53 }
 0x639   : > { %4901 = vrcp.f32 %v3555_v20 }
 0x63a   : > { %4903 = vrcp.f32 %v3553_v44 }
 0x63b   : > { %4905 = vpow2.f32 %v4032_v31 }
 0x63c   : > { %4907 = vpow2.f32 %v4035_v60 }
 0x63d   : > { %4909 = vpow2.f32 %v4033_v49 }
 0x640   : > { %v4896_v22 = vpop.eup %4895 }
 0x641   : > { %v4898_v26 = vpop.eup %4897  ;;  %v3558_v40 = vadd.f32 1.0, %v4896_v22  ;;  %v4527_v57 = vpop.f32.mrb[136].mxu0 }
 0x642   : > { %v4900_v27 = vpop.eup %4899  ;;  %v3418_v2 = vadd.f32 %v4527_v57, %v6250_v15  ;;  %v3409_v23 = vpop.f32.mrb[137].mxu0 }
 0x643   : > { %v4902_v5 = vpop.eup %4901  ;;  %v3410_v55 = vadd.f32 %v6250_v15, %v3409_v23  ;;  %v4528_v36 = vpop.f32.mrb[138].mxu0  ;;  %4911 = vrcp.f32 %v3558_v40 }
 0x644   : > { %v4904_v0 = vpop.eup %4903  ;;  %v4158_v51 = vpack.c.bf16 %v4902_v5, %v4898_v26  ;;  %v4038_v43 = vmul.f32 -1.442695, %v3418_v2  ;;  %v3421_v61 = vadd.f32 %v4528_v36, %v6250_v15  ;;  %v3412_v13 = vpop.f32.mrb[139].mxu0 }
 0x645   : > { %v4906_v11 = vpop.eup %4905  ;;  %v4153_v24 = vpack.c.bf16 %v4904_v0, %v4900_v27  ;;  %v4036_v14 = vmul.f32 -1.442695, %v3410_v55  ;;  %v3413_v42 = vadd.f32 %v6250_v15, %v3412_v13 }
 0x646   : > { %v4908_v18 = vpop.eup %4907  ;;  %4198 = vst [vmem:[%s6265_s14 + $0x48] sm:$0xff] %v4158_v51   ;;  %v3556_v33 = vadd.f32 1.0, %v4906_v11  ;;  %4913 = vpow2.f32 %v4038_v43  ;;  %v4039_v46 = vmul.f32 -1.442695, %v3421_v61 }
 0x647   : > { %v4910_v58 = vpop.eup %4909  ;;  %4197 = vst [vmem:[%s6265_s14 + $0x40] sm:$0xff] %v4153_v24   ;;  %v3559_v16 = vadd.f32 1.0, %v4908_v18  ;;  %4915 = vpow2.f32 %v4036_v14  ;;  %v4037_v50 = vmul.f32 -1.442695, %v3413_v42 }
 0x648   : > { %4917 = vrcp.f32 %v3556_v33  ;;  %v3557_v1 = vadd.f32 1.0, %v4910_v58 }
 0x649   : > { %4919 = vrcp.f32 %v3559_v16 }
 0x64a   : > { %4921 = vrcp.f32 %v3557_v1 }
 0x64b   : > { %4923 = vpow2.f32 %v4039_v46 }
 0x64c   : > { %4925 = vpow2.f32 %v4037_v50 }
 0x64d   : > { %v4912_v19 = vpop.eup %4911 }
 0x650   : > { %v4914_v3 = vpop.eup %4913 }
 0x651   : > { %v4916_v39 = vpop.eup %4915  ;;  %v3562_v63 = vadd.f32 1.0, %v4914_v3  ;;  %v4531_v28 = vpop.f32.mrb[140].mxu0 }
 0x652   : > { %v4918_v45 = vpop.eup %4917  ;;  %v3560_v7 = vadd.f32 1.0, %v4916_v39  ;;  %v3434_v32 = vadd.f32 %v4531_v28, %v6250_v15  ;;  %v3425_v25 = vpop.f32.mrb[141].mxu0 }
 0x653   : > { %v4920_v10 = vpop.eup %4919  ;;  %v3426_v48 = vadd.f32 %v6250_v15, %v3425_v25  ;;  %v4532_v41 = vpop.f32.mrb[142].mxu0  ;;  %4927 = vrcp.f32 %v3562_v63 }
 0x654   : > { %v4922_v62 = vpop.eup %4921  ;;  %v4168_v37 = vpack.c.bf16 %v4920_v10, %v4912_v19  ;;  %v4042_v12 = vmul.f32 -1.442695, %v3434_v32  ;;  %v3437_v8 = vadd.f32 %v4532_v41, %v6250_v15  ;;  %v3428_v34 = vpop.f32.mrb[143].mxu0  ;;  %4929 = vrcp.f32 %v3560_v7 }
 0x655   : > { %v4924_v35 = vpop.eup %4923  ;;  %v4163_v29 = vpack.c.bf16 %v4922_v62, %v4918_v45  ;;  %v4040_v47 = vmul.f32 -1.442695, %v3426_v48  ;;  %v3429_v6 = vadd.f32 %v6250_v15, %v3428_v34 }
 0x656   : > { %v4926_v9 = vpop.eup %4925  ;;  %4200 = vst [vmem:[%s6265_s14 + $0x58] sm:$0xff] %v4168_v37   ;;  %v3563_v38 = vadd.f32 1.0, %v4924_v35  ;;  %4931 = vpow2.f32 %v4042_v12  ;;  %v4043_v30 = vmul.f32 -1.442695, %v3437_v8 }
 0x657   : > { %4199 = vst [vmem:[%s6265_s14 + $0x50] sm:$0xff] %v4163_v29   ;;  %v3561_v21 = vadd.f32 1.0, %v4926_v9  ;;  %4933 = vpow2.f32 %v4040_v47  ;;  %v4041_v52 = vmul.f32 -1.442695, %v3429_v6 }
 0x658   : > { %4935 = vrcp.f32 %v3563_v38 }
 0x659   : > { %4937 = vrcp.f32 %v3561_v21 }
 0x65a   : > { %4939 = vpow2.f32 %v4043_v30 }
 0x65b   : > { %4941 = vpow2.f32 %v4041_v52 }
 0x65d   : > { %v4928_v17 = vpop.eup %4927 }
 0x65e   : > { %v4930_v59 = vpop.eup %4929 }
 0x660   : > { %v4932_v4 = vpop.eup %4931 }
 0x661   : > { %v4934_v56 = vpop.eup %4933  ;;  %v3566_v15 = vadd.f32 1.0, %v4932_v4 }
 0x662   : > { %v4936_v54 = vpop.eup %4935  ;;  %v3564_v53 = vadd.f32 1.0, %v4934_v56 }
 0x663   : > { %v4938_v20 = vpop.eup %4937  ;;  %v4178_v31 = vpack.c.bf16 %v4936_v54, %v4928_v17  ;;  %4943 = vrcp.f32 %v3566_v15 }
 0x664   : > { %v4940_v44 = vpop.eup %4939  ;;  %v4173_v60 = vpack.c.bf16 %v4938_v20, %v4930_v59  ;;  %4945 = vrcp.f32 %v3564_v53 }
 0x665   : > { %v4942_v49 = vpop.eup %4941  ;;  %4202 = vst [vmem:[%s6265_s14 + $0x68] sm:$0xff] %v4178_v31   ;;  %v3567_v22 = vadd.f32 1.0, %v4940_v44 }
 0x666   : > { %4201 = vst [vmem:[%s6265_s14 + $0x60] sm:$0xff] %v4173_v60   ;;  %v3565_v26 = vadd.f32 1.0, %v4942_v49 }
 0x667   : > { %4947 = vrcp.f32 %v3567_v22 }
 0x668   : > { %4949 = vrcp.f32 %v3565_v26 }
 0x66d   : > { %v4944_v40 = vpop.eup %4943 }
 0x66e   : > { %v4946_v57 = vpop.eup %4945 }
 0x671   : > { %v4948_v27 = vpop.eup %4947 }
 0x672   : > { %v4950_v2 = vpop.eup %4949  ;;  %v4188_v23 = vpack.c.bf16 %v4948_v27, %v4944_v40 }
 0x673   : > { %v4183_v5 = vpack.c.bf16 %v4950_v2, %v4946_v57 }
 0x674   : > { %4204 = vst [vmem:[%s6265_s14 + $0x78] sm:$0xff] %v4188_v23  }
 0x675   : > { %4203 = vst [vmem:[%s6265_s14 + $0x70] sm:$0xff] %v4183_v5  }
 0x676 PF: > { %s23_s25 = sadd.s32 1, %s4957_s25  }
 0x677   : > { %p20_p4 = scmp.ge.s32.totalorder %s23_s25, 4  }
 0x679   :  { %22 = sbr.rel (!%p20_p4) target bundleno = 1 (0x1), region = 102 }

</bundles_post_ra>
